<compile_context>
chip_gen: v7x
topology: tpu7x:2x2x1
jax: 0.10.0
libtpu: 0.0.40
codegen_flags: <defaults>
</compile_context>

<pallas_src>
from functools import partial

import jax
import jax.numpy as jnp
from jax.experimental import pallas as pl
from jax.experimental.pallas import tpu as pltpu


def _attention_cnn_kernel(b_tile, L, nheads,
                          x_ref,
                          wqkv_ref, bqkv_ref,
                          wp_ref, bp_ref,
                          w1_ref, b1_ref, w2_ref, b2_ref,
                          bn_scale_ref, bn_shift_ref,
                          head_mask_ref,
                          o_ref,
                          qm_sc, k_sc, v_sc, attn_sc):
    x = x_ref[...]                                   # (R, C) f32, R = b_tile*L
    R, C = x.shape
    NL = nheads * L

    xb = x.astype(jnp.bfloat16)

    # Fused 1x1-conv Q/K/V projection: one (R, 3C) matmul (bf16 in, f32 acc).
    # The attention scale 1/sqrt(head_dim) is already folded into the Wq / bq
    # slice of the fused weight in the wrapper.
    qkv = jnp.dot(xb, wqkv_ref[...], preferred_element_type=jnp.float32) + bqkv_ref[...]
    q = qkv[:, :C]
    k = qkv[:, C:2 * C]
    v = qkv[:, 2 * C:]

    head_mask = head_mask_ref[...]                   # (nheads, 1, C) f32 in {0,1}

    # Head-stacked masked Q for the whole folded block, built ONCE: row block h
    # of batch b holds q_b with only head-h channels live.  Stage Q/K/V to bf16
    # VMEM so the per-batch loop below has bounded live ranges (no f32 q/k/v
    # values held across iterations).
    qm = q.reshape(b_tile, 1, L, C) * head_mask[None]           # (b_tile, nheads, L, C)
    qm_sc[...] = qm.reshape(b_tile, NL, C).astype(jnp.bfloat16)
    k_sc[...] = k.reshape(b_tile, L, C).astype(jnp.bfloat16)
    v_sc[...] = v.reshape(b_tile, L, C).astype(jnp.bfloat16)

    def attn_body(b, carry):
        qm_b = qm_sc[b]                              # (nheads*L, C) bf16
        k_b = k_sc[b]                                # (L, C) bf16
        v_b = v_sc[b]                                # (L, C) bf16

        # Scores: row block h == q_h @ k_h^T (masked channels contribute 0).
        s = jax.lax.dot_general(qm_b, k_b, (((1,), (1,)), ((), ())),
                                preferred_element_type=jnp.float32)   # (NL, L)
        s = s - jnp.max(s, axis=-1, keepdims=True)
        p = jnp.exp(s)
        p = p * pl.reciprocal(jnp.sum(p, axis=-1, keepdims=True), approx=True)

        om = jnp.dot(p.astype(jnp.bfloat16), v_b,
                     preferred_element_type=jnp.float32)              # (NL, C)
        # Keep only head-h channels from row block h and collapse heads.
        attn_b = jnp.sum(om.reshape(nheads, L, C) * head_mask, axis=0)  # (L, C)
        attn_sc[b] = attn_b.astype(jnp.bfloat16)
        return carry

    jax.lax.fori_loop(0, b_tile, attn_body, 0)

    attn = attn_sc[...].reshape(R, C)                # bf16

    # Output 1x1 projection over all folded rows at once.
    a = jnp.dot(attn, wp_ref[...], preferred_element_type=jnp.float32) + bp_ref[...]

    # dropout (eval) == identity; residual add; folded BatchNorm2d (running stats).
    h1 = (a + x) * bn_scale_ref[...] + bn_shift_ref[...]

    # FFN: 1x1 conv C->4C, relu, 1x1 conv 4C->C.
    f = jnp.dot(h1.astype(jnp.bfloat16), w1_ref[...],
                preferred_element_type=jnp.float32) + b1_ref[...]
    f = jnp.maximum(f, 0.0)
    g = jnp.dot(f.astype(jnp.bfloat16), w2_ref[...],
                preferred_element_type=jnp.float32) + b2_ref[...]

    h2 = (g + h1) * bn_scale_ref[...] + bn_shift_ref[...]

    if o_ref.shape == h2.shape:
        o_ref[...] = h2
    else:
        # Lane-dense store: (R, C) -> (R*C//128, 128); identical row-major bytes.
        o_ref[...] = h2.reshape(o_ref.shape)


def _pick_b_tile(B, L):
    """Smallest divisor of B whose row block satisfies the sublane (%8) rule ->
    maximizes grid steps (v7x has 2 TensorCores; >=2 steps also buys DMA/compute
    pipelining everywhere).  Falls back to the full batch (single step; block ==
    full array, so the divisibility rule is relaxed)."""
    for d in range(1, B + 1):
        if B % d == 0 and (d * L) % 8 == 0:
            return d
    return B


def attention_cnn_block(x_nchw, params, *, nheads, eps=1e-5):
    """x_nchw: (B, C, H, W) fp32.  Returns (B, C, H, W) fp32 (eval-mode forward)."""
    B, C, H, W = x_nchw.shape
    L = H * W
    assert C % nheads == 0
    D = C // nheads

    (wqkv, bqkv, wproj, bproj, w1, b1, w2, b2, gamma, beta, mean, var) = params

    # NCHW -> (B*L, C): channels on the lane axis, batch folded into rows.
    # TODO(synk): for a stack of these blocks, keep activations channels-last
    # across blocks to avoid the two NCHW<->NHWC HBM round trips per block.
    x2d = jnp.transpose(x_nchw, (0, 2, 3, 1)).reshape(B * L, C).astype(jnp.float32)

    # Fused QKV weight (in, out) with the attention scale folded into the Q slice.
    scale = 1.0 / (D ** 0.5)
    wqkv_t = jnp.transpose(wqkv).astype(jnp.float32)                  # (C, 3C)
    wqkv_t = jnp.concatenate([wqkv_t[:, :C] * scale, wqkv_t[:, C:]], axis=1)
    bqkv_s = jnp.concatenate([bqkv[:C] * scale, bqkv[C:]])
    wqkv_b = wqkv_t.astype(jnp.bfloat16)

    def w_t(w):
        return jnp.transpose(w).astype(jnp.bfloat16)

    def row(b):
        return b.reshape(1, -1).astype(jnp.float32)

    # Eval-mode BatchNorm folded into per-channel scale/shift.
    inv = jax.lax.rsqrt(var + eps)
    bn_scale = (gamma * inv).reshape(1, C).astype(jnp.float32)
    bn_shift = (beta - mean * gamma * inv).reshape(1, C).astype(jnp.float32)

    # 0/1 mask selecting each head's channel block (head h owns [h*D, (h+1)*D)).
    head_ids = jnp.arange(C, dtype=jnp.int32) // D
    head_mask = (head_ids[None, :] == jnp.arange(nheads, dtype=jnp.int32)[:, None])
    head_mask = head_mask.astype(jnp.float32).reshape(nheads, 1, C)

    b_tile = _pick_b_tile(B, L)
    num_tiles = B // b_tile
    R = b_tile * L

    args = [x2d,
            wqkv_b, row(bqkv_s),
            w_t(wproj), row(bproj),
            w_t(w1), row(b1), w_t(w2), row(b2),
            bn_scale, bn_shift, head_mask]

    def resident(a):
        nd = a.ndim
        # TODO(synk): at production C, add pipeline_mode=pl.Buffered(1) here and
        # set CompilerParams(vmem_limit_bytes=...) so resident FFN weights are
        # not double-buffered (matters on v7x's 64 MiB VMEM).
        return pl.BlockSpec(a.shape, lambda i, _nd=nd: (0,) * _nd)

    in_specs = [pl.BlockSpec((R, C), lambda i: (i, 0))] + [resident(a) for a in args[1:]]

    scratch = [pltpu.VMEM((b_tile, nheads * L, C), jnp.bfloat16),   # head-stacked masked Q
               pltpu.VMEM((b_tile, L, C), jnp.bfloat16),            # K
               pltpu.VMEM((b_tile, L, C), jnp.bfloat16),            # V
               pltpu.VMEM((b_tile, L, C), jnp.bfloat16)]            # attention output

    def build(lane_dense):
        if lane_dense:
            out_shape = jax.ShapeDtypeStruct(((B * L * C) // 128, 128), jnp.float32)
            out_spec = pl.BlockSpec(((R * C) // 128, 128), lambda i: (i, 0))
        else:
            out_shape = jax.ShapeDtypeStruct((B * L, C), jnp.float32)
            out_spec = pl.BlockSpec((R, C), lambda i: (i, 0))
        return pl.pallas_call(
            partial(_attention_cnn_kernel, b_tile, L, nheads),
            out_shape=out_shape,
            grid=(num_tiles,),
            in_specs=in_specs,
            out_specs=out_spec,
            scratch_shapes=scratch,
            compiler_params=pltpu.CompilerParams(dimension_semantics=("parallel",)),
        )

    lane_dense_ok = ((R * C) % 128 == 0
                     and (num_tiles == 1 or ((R * C) // 128) % 8 == 0))

    out2d = None
    if lane_dense_ok:
        try:
            out2d = jax.block_until_ready(build(True)(*args))
        except Exception:
            out2d = None     # lane-dense relayout not supported -> fall back
    if out2d is None:
        out2d = build(False)(*args)

    return jnp.transpose(out2d.reshape(B, H, W, C), (0, 3, 1, 2))


def reference(x_nchw, params, *, nheads, eps=1e-5):
    """Pure-JAX f32 reference of the same forward pass (channels-last)."""
    wqkv, bqkv, wproj, bproj, w1, b1, w2, b2, gamma, beta, mean, var = params
    B, C, H, W = x_nchw.shape
    L = H * W
    D = C // nheads
    x = jnp.transpose(x_nchw, (0, 2, 3, 1)).reshape(B, L, C)

    qkv = x @ wqkv.T + bqkv                       # (B, L, 3C)
    q, k, v = jnp.split(qkv, 3, axis=-1)
    q = q.reshape(B, L, nheads, D).transpose(0, 2, 1, 3)
    k = k.reshape(B, L, nheads, D).transpose(0, 2, 1, 3)
    v = v.reshape(B, L, nheads, D).transpose(0, 2, 1, 3)
    s = jnp.einsum("bhld,bhmd->bhlm", q, k) / jnp.sqrt(jnp.float32(D))
    p = jax.nn.softmax(s, axis=-1)
    a = jnp.einsum("bhlm,bhmd->bhld", p, v).transpose(0, 2, 1, 3).reshape(B, L, C)
    a = a @ wproj.T + bproj

    h1 = a + x
    h1 = (h1 - mean) * jax.lax.rsqrt(var + eps) * gamma + beta

    f = jnp.maximum(h1 @ w1.T + b1, 0.0)
    f = f @ w2.T + b2
    h2 = f + h1
    h2 = (h2 - mean) * jax.lax.rsqrt(var + eps) * gamma + beta
    return jnp.transpose(h2.reshape(B, H, W, C), (0, 3, 1, 2))


if __name__ == "__main__":
    B, C, H, W = 2, 32, 8, 8
    NHEADS = 4

    key = jax.random.PRNGKey(0)
    ks = jax.random.split(key, 13)
    std = 0.1
    params = (
        jax.random.normal(ks[0], (3 * C, C), jnp.float32) * std,     # w_qkv (out, in)
        jax.random.normal(ks[1], (3 * C,), jnp.float32) * std,       # b_qkv
        jax.random.normal(ks[2], (C, C), jnp.float32) * std,         # w_proj
        jax.random.normal(ks[3], (C,), jnp.float32) * std,           # b_proj
        jax.random.normal(ks[4], (4 * C, C), jnp.float32) * std,     # w_ff1
        jax.random.normal(ks[5], (4 * C,), jnp.float32) * std,       # b_ff1
        jax.random.normal(ks[6], (C, 4 * C), jnp.float32) * std,     # w_ff2
        jax.random.normal(ks[7], (C,), jnp.float32) * std,           # b_ff2
        1.0 + jax.random.normal(ks[8], (C,), jnp.float32) * 0.05,    # bn gamma
        jax.random.normal(ks[9], (C,), jnp.float32) * 0.05,          # bn beta
        jax.random.normal(ks[10], (C,), jnp.float32) * 0.05,         # bn running_mean
        1.0 + jax.random.uniform(ks[11], (C,), jnp.float32) * 0.5,   # bn running_var
    )
    x = jax.random.normal(ks[12], (B, C, H, W), jnp.float32)

    out = attention_cnn_block(x, params, nheads=NHEADS)
    out = jax.block_until_ready(out)

    ref = reference(x, params, nheads=NHEADS)
    assert out.shape == (B, C, H, W)
    # bf16 MXU inputs (f32 accumulate) + approx reciprocal -> relaxed tolerance
    # vs. the pure-f32 reference.
    err = float(jnp.max(jnp.abs(out - ref)))
    assert jnp.allclose(out, ref, atol=5e-2, rtol=5e-2), err

    print("KERNEL_OK")
</pallas_src>

<mosaic_0001>
module attributes {stable_mosaic.version = 11 : i64} {
  func.func @_attention_cnn_kernel(%arg0: i32, %arg1: memref<64x32xf32, #tpu.memory_space<vmem>>, %arg2: memref<32x96xbf16, #tpu.memory_space<vmem>>, %arg3: memref<1x96xf32, #tpu.memory_space<vmem>>, %arg4: memref<32x32xbf16, #tpu.memory_space<vmem>>, %arg5: memref<1x32xf32, #tpu.memory_space<vmem>>, %arg6: memref<32x128xbf16, #tpu.memory_space<vmem>>, %arg7: memref<1x128xf32, #tpu.memory_space<vmem>>, %arg8: memref<128x32xbf16, #tpu.memory_space<vmem>>, %arg9: memref<1x32xf32, #tpu.memory_space<vmem>>, %arg10: memref<1x32xf32, #tpu.memory_space<vmem>>, %arg11: memref<1x32xf32, #tpu.memory_space<vmem>>, %arg12: memref<4x1x32xf32, #tpu.memory_space<vmem>>, %arg13: memref<16x128xf32, #tpu.memory_space<vmem>>, %arg14: memref<1x256x32xbf16, #tpu.memory_space<vmem>>, %arg15: memref<1x64x32xbf16, #tpu.memory_space<vmem>>, %arg16: memref<1x64x32xbf16, #tpu.memory_space<vmem>>, %arg17: memref<1x64x32xbf16, #tpu.memory_space<vmem>>) attributes {dimension_semantics = [#tpu.dimension_semantics<parallel>], iteration_bounds = array<i64: 2>, scalar_prefetch = 0 : i64, scratch_operands = 4 : i64, tpu.core_type = #tpu.core_type<tc>, window_params = [{transform_indices = @transform_0, window_bounds = array<i64: 64, 32>}, {pipeline_mode = #tpu.pipeline_mode<synchronous>, transform_indices = @transform_1, window_bounds = array<i64: 32, 96>}, {pipeline_mode = #tpu.pipeline_mode<synchronous>, transform_indices = @transform_2, window_bounds = array<i64: 1, 96>}, {pipeline_mode = #tpu.pipeline_mode<synchronous>, transform_indices = @transform_3, window_bounds = array<i64: 32, 32>}, {pipeline_mode = #tpu.pipeline_mode<synchronous>, transform_indices = @transform_4, window_bounds = array<i64: 1, 32>}, {pipeline_mode = #tpu.pipeline_mode<synchronous>, transform_indices = @transform_5, window_bounds = array<i64: 32, 128>}, {pipeline_mode = #tpu.pipeline_mode<synchronous>, transform_indices = @transform_6, window_bounds = array<i64: 1, 128>}, {pipeline_mode = #tpu.pipeline_mode<synchronous>, transform_indices = @transform_7, window_bounds = array<i64: 128, 32>}, {pipeline_mode = #tpu.pipeline_mode<synchronous>, transform_indices = @transform_8, window_bounds = array<i64: 1, 32>}, {pipeline_mode = #tpu.pipeline_mode<synchronous>, transform_indices = @transform_9, window_bounds = array<i64: 1, 32>}, {pipeline_mode = #tpu.pipeline_mode<synchronous>, transform_indices = @transform_10, window_bounds = array<i64: 1, 32>}, {pipeline_mode = #tpu.pipeline_mode<synchronous>, transform_indices = @transform_11, window_bounds = array<i64: 4, 1, 32>}, {transform_indices = @transform_12, window_bounds = array<i64: 16, 128>}]} {
    %c0 = arith.constant 0 : index
    %c0_0 = arith.constant 0 : index
    %0 = vector.load %arg1[%c0, %c0_0] : memref<64x32xf32, #tpu.memory_space<vmem>>, vector<64x32xf32>
    %1 = arith.truncf %0 : vector<64x32xf32> to vector<64x32xbf16>
    %c0_1 = arith.constant 0 : index
    %c0_2 = arith.constant 0 : index
    %2 = vector.load %arg2[%c0_1, %c0_2] : memref<32x96xbf16, #tpu.memory_space<vmem>>, vector<32x96xbf16>
    %cst = arith.constant dense<0.000000e+00> : vector<64x96xf32>
    %3 = tpu.matmul %1, %2, %cst {dimension_numbers = #tpu.dot_dimension_numbers<[1], [0], [0], [1], [0, 0, 1, 1], [], []>} : vector<64x32xbf16>, vector<32x96xbf16>, vector<64x96xf32> -> vector<64x96xf32>
    %c0_3 = arith.constant 0 : index
    %c0_4 = arith.constant 0 : index
    %4 = vector.load %arg3[%c0_3, %c0_4] : memref<1x96xf32, #tpu.memory_space<vmem>>, vector<1x96xf32>
    %5 = vector.broadcast %4 : vector<1x96xf32> to vector<64x96xf32>
    %6 = arith.addf %3, %5 : vector<64x96xf32>
    %7 = vector.extract_strided_slice %6 {offsets = [0, 0], sizes = [64, 32], strides = [1, 1]} : vector<64x96xf32> to vector<64x32xf32>
    %8 = vector.extract_strided_slice %6 {offsets = [0, 32], sizes = [64, 32], strides = [1, 1]} : vector<64x96xf32> to vector<64x32xf32>
    %9 = vector.extract_strided_slice %6 {offsets = [0, 64], sizes = [64, 32], strides = [1, 1]} : vector<64x96xf32> to vector<64x32xf32>
    %c0_5 = arith.constant 0 : index
    %c0_6 = arith.constant 0 : index
    %c0_7 = arith.constant 0 : index
    %10 = vector.load %arg12[%c0_5, %c0_6, %c0_7] : memref<4x1x32xf32, #tpu.memory_space<vmem>>, vector<4x1x32xf32>
    %11 = vector.shape_cast %7 : vector<64x32xf32> to vector<1x1x64x32xf32>
    %12 = vector.shape_cast %10 : vector<4x1x32xf32> to vector<1x4x1x32xf32>
    %13 = vector.broadcast %11 : vector<1x1x64x32xf32> to vector<1x4x64x32xf32>
    %14 = vector.broadcast %12 : vector<1x4x1x32xf32> to vector<1x4x64x32xf32>
    %15 = arith.mulf %13, %14 : vector<1x4x64x32xf32>
    %16 = vector.shape_cast %15 : vector<1x4x64x32xf32> to vector<1x256x32xf32>
    %17 = arith.truncf %16 : vector<1x256x32xf32> to vector<1x256x32xbf16>
    %c0_8 = arith.constant 0 : index
    %c0_9 = arith.constant 0 : index
    %c0_10 = arith.constant 0 : index
    %18 = vector.load %arg14[%c0_8, %c0_9, %c0_10] : memref<1x256x32xbf16, #tpu.memory_space<vmem>>, vector<1x256x32xbf16>
    tpu.vector_store %arg14[%c0_8, %c0_9, %c0_10], %17 {strides = array<i32>} : memref<1x256x32xbf16, #tpu.memory_space<vmem>>, vector<1x256x32xbf16>,
    %19 = vector.shape_cast %8 : vector<64x32xf32> to vector<1x64x32xf32>
    %20 = arith.truncf %19 : vector<1x64x32xf32> to vector<1x64x32xbf16>
    %c0_11 = arith.constant 0 : index
    %c0_12 = arith.constant 0 : index
    %c0_13 = arith.constant 0 : index
    %21 = vector.load %arg15[%c0_11, %c0_12, %c0_13] : memref<1x64x32xbf16, #tpu.memory_space<vmem>>, vector<1x64x32xbf16>
    tpu.vector_store %arg15[%c0_11, %c0_12, %c0_13], %20 {strides = array<i32>} : memref<1x64x32xbf16, #tpu.memory_space<vmem>>, vector<1x64x32xbf16>,
    %22 = vector.shape_cast %9 : vector<64x32xf32> to vector<1x64x32xf32>
    %23 = arith.truncf %22 : vector<1x64x32xf32> to vector<1x64x32xbf16>
    %c0_14 = arith.constant 0 : index
    %c0_15 = arith.constant 0 : index
    %c0_16 = arith.constant 0 : index
    %24 = vector.load %arg16[%c0_14, %c0_15, %c0_16] : memref<1x64x32xbf16, #tpu.memory_space<vmem>>, vector<1x64x32xbf16>
    tpu.vector_store %arg16[%c0_14, %c0_15, %c0_16], %23 {strides = array<i32>} : memref<1x64x32xbf16, #tpu.memory_space<vmem>>, vector<1x64x32xbf16>,
    %c0_i32 = arith.constant 0 : i32
    %25 = arith.index_cast %c0_i32 : i32 to index
    %c0_17 = arith.constant 0 : index
    %c0_18 = arith.constant 0 : index
    %26 = vector.load %arg14[%25, %c0_17, %c0_18] : memref<1x256x32xbf16, #tpu.memory_space<vmem>>, vector<1x256x32xbf16>
    %27 = vector.shape_cast %26 : vector<1x256x32xbf16> to vector<256x32xbf16>
    %28 = arith.index_cast %c0_i32 : i32 to index
    %c0_19 = arith.constant 0 : index
    %c0_20 = arith.constant 0 : index
    %29 = vector.load %arg15[%28, %c0_19, %c0_20] : memref<1x64x32xbf16, #tpu.memory_space<vmem>>, vector<1x64x32xbf16>
    %30 = vector.shape_cast %29 : vector<1x64x32xbf16> to vector<64x32xbf16>
    %31 = arith.index_cast %c0_i32 : i32 to index
    %c0_21 = arith.constant 0 : index
    %c0_22 = arith.constant 0 : index
    %32 = vector.load %arg16[%31, %c0_21, %c0_22] : memref<1x64x32xbf16, #tpu.memory_space<vmem>>, vector<1x64x32xbf16>
    %33 = vector.shape_cast %32 : vector<1x64x32xbf16> to vector<64x32xbf16>
    %cst_23 = arith.constant dense<0.000000e+00> : vector<256x64xf32>
    %34 = tpu.matmul %27, %30, %cst_23 {dimension_numbers = #tpu.dot_dimension_numbers<[1], [1], [0], [0], [0, 0, 1, 0], [], []>} : vector<256x32xbf16>, vector<64x32xbf16>, vector<256x64xf32> -> vector<256x64xf32>
    %cst_24 = arith.constant dense<0xFF800000> : vector<256xf32>
    %35 = vector.multi_reduction <maximumf>, %34, %cst_24 [1] : vector<256x64xf32> to vector<256xf32>
    %36 = vector.shape_cast %35 : vector<256xf32> to vector<256x1xf32>
    %37 = vector.broadcast %36 : vector<256x1xf32> to vector<256x64xf32>
    %38 = arith.subf %34, %37 : vector<256x64xf32>
    %39 = math.exp %38 : vector<256x64xf32>
    %cst_25 = arith.constant dense<0.000000e+00> : vector<256xf32>
    %40 = vector.multi_reduction <add>, %39, %cst_25 [1] : vector<256x64xf32> to vector<256xf32>
    %41 = vector.shape_cast %40 : vector<256xf32> to vector<256x1xf32>
    %42 = tpu.reciprocal %41 {approx = true} : vector<256x1xf32> -> vector<256x1xf32>
    %43 = vector.broadcast %42 : vector<256x1xf32> to vector<256x64xf32>
    %44 = arith.mulf %39, %43 : vector<256x64xf32>
    %45 = arith.truncf %44 : vector<256x64xf32> to vector<256x64xbf16>
    %cst_26 = arith.constant dense<0.000000e+00> : vector<256x32xf32>
    %46 = tpu.matmul %45, %33, %cst_26 {dimension_numbers = #tpu.dot_dimension_numbers<[1], [0], [0], [1], [0, 0, 1, 1], [], []>} : vector<256x64xbf16>, vector<64x32xbf16>, vector<256x32xf32> -> vector<256x32xf32>
    %47 = vector.shape_cast %46 : vector<256x32xf32> to vector<4x64x32xf32>
    %48 = vector.broadcast %10 : vector<4x1x32xf32> to vector<4x64x32xf32>
    %49 = arith.mulf %47, %48 : vector<4x64x32xf32>
    %cst_27 = arith.constant dense<0.000000e+00> : vector<64x32xf32>
    %50 = vector.multi_reduction <add>, %49, %cst_27 [0] : vector<4x64x32xf32> to vector<64x32xf32>
    %51 = arith.truncf %50 : vector<64x32xf32> to vector<64x32xbf16>
    %52 = arith.index_cast %c0_i32 : i32 to index
    %c0_28 = arith.constant 0 : index
    %c0_29 = arith.constant 0 : index
    %53 = vector.load %arg17[%52, %c0_28, %c0_29] : memref<1x64x32xbf16, #tpu.memory_space<vmem>>, vector<1x64x32xbf16>
    %54 = vector.shape_cast %53 : vector<1x64x32xbf16> to vector<64x32xbf16>
    %55 = vector.shape_cast %51 : vector<64x32xbf16> to vector<1x64x32xbf16>
    tpu.vector_store %arg17[%52, %c0_28, %c0_29], %55 {strides = array<i32>} : memref<1x64x32xbf16, #tpu.memory_space<vmem>>, vector<1x64x32xbf16>,
    %c1_i32 = arith.constant 1 : i32
    %c0_30 = arith.constant 0 : index
    %c0_31 = arith.constant 0 : index
    %c0_32 = arith.constant 0 : index
    %56 = vector.load %arg17[%c0_30, %c0_31, %c0_32] : memref<1x64x32xbf16, #tpu.memory_space<vmem>>, vector<1x64x32xbf16>
    %57 = vector.shape_cast %56 : vector<1x64x32xbf16> to vector<64x32xbf16>
    %c0_33 = arith.constant 0 : index
    %c0_34 = arith.constant 0 : index
    %58 = vector.load %arg4[%c0_33, %c0_34] : memref<32x32xbf16, #tpu.memory_space<vmem>>, vector<32x32xbf16>
    %cst_35 = arith.constant dense<0.000000e+00> : vector<64x32xf32>
    %59 = tpu.matmul %57, %58, %cst_35 {dimension_numbers = #tpu.dot_dimension_numbers<[1], [0], [0], [1], [0, 0, 1, 1], [], []>} : vector<64x32xbf16>, vector<32x32xbf16>, vector<64x32xf32> -> vector<64x32xf32>
    %c0_36 = arith.constant 0 : index
    %c0_37 = arith.constant 0 : index
    %60 = vector.load %arg5[%c0_36, %c0_37] : memref<1x32xf32, #tpu.memory_space<vmem>>, vector<1x32xf32>
    %61 = vector.broadcast %60 : vector<1x32xf32> to vector<64x32xf32>
    %62 = arith.addf %59, %61 : vector<64x32xf32>
    %63 = arith.addf %62, %0 : vector<64x32xf32>
    %c0_38 = arith.constant 0 : index
    %c0_39 = arith.constant 0 : index
    %64 = vector.load %arg10[%c0_38, %c0_39] : memref<1x32xf32, #tpu.memory_space<vmem>>, vector<1x32xf32>
    %65 = vector.broadcast %64 : vector<1x32xf32> to vector<64x32xf32>
    %66 = arith.mulf %63, %65 : vector<64x32xf32>
    %c0_40 = arith.constant 0 : index
    %c0_41 = arith.constant 0 : index
    %67 = vector.load %arg11[%c0_40, %c0_41] : memref<1x32xf32, #tpu.memory_space<vmem>>, vector<1x32xf32>
    %68 = vector.broadcast %67 : vector<1x32xf32> to vector<64x32xf32>
    %69 = arith.addf %66, %68 : vector<64x32xf32>
    %70 = arith.truncf %69 : vector<64x32xf32> to vector<64x32xbf16>
    %c0_42 = arith.constant 0 : index
    %c0_43 = arith.constant 0 : index
    %71 = vector.load %arg6[%c0_42, %c0_43] : memref<32x128xbf16, #tpu.memory_space<vmem>>, vector<32x128xbf16>
    %cst_44 = arith.constant dense<0.000000e+00> : vector<64x128xf32>
    %72 = tpu.matmul %70, %71, %cst_44 {dimension_numbers = #tpu.dot_dimension_numbers<[1], [0], [0], [1], [0, 0, 1, 1], [], []>} : vector<64x32xbf16>, vector<32x128xbf16>, vector<64x128xf32> -> vector<64x128xf32>
    %c0_45 = arith.constant 0 : index
    %c0_46 = arith.constant 0 : index
    %73 = vector.load %arg7[%c0_45, %c0_46] : memref<1x128xf32, #tpu.memory_space<vmem>>, vector<1x128xf32>
    %74 = vector.broadcast %73 : vector<1x128xf32> to vector<64x128xf32>
    %75 = arith.addf %72, %74 : vector<64x128xf32>
    %cst_47 = arith.constant 0.000000e+00 : f32
    %76 = vector.broadcast %cst_47 : f32 to vector<64x128xf32>
    %77 = arith.maximumf %75, %76 : vector<64x128xf32>
    %78 = arith.truncf %77 : vector<64x128xf32> to vector<64x128xbf16>
    %c0_48 = arith.constant 0 : index
    %c0_49 = arith.constant 0 : index
    %79 = vector.load %arg8[%c0_48, %c0_49] : memref<128x32xbf16, #tpu.memory_space<vmem>>, vector<128x32xbf16>
    %cst_50 = arith.constant dense<0.000000e+00> : vector<64x32xf32>
    %80 = tpu.matmul %78, %79, %cst_50 {dimension_numbers = #tpu.dot_dimension_numbers<[1], [0], [0], [1], [0, 0, 1, 1], [], []>} : vector<64x128xbf16>, vector<128x32xbf16>, vector<64x32xf32> -> vector<64x32xf32>
    %c0_51 = arith.constant 0 : index
    %c0_52 = arith.constant 0 : index
    %81 = vector.load %arg9[%c0_51, %c0_52] : memref<1x32xf32, #tpu.memory_space<vmem>>, vector<1x32xf32>
    %82 = vector.broadcast %81 : vector<1x32xf32> to vector<64x32xf32>
    %83 = arith.addf %80, %82 : vector<64x32xf32>
    %84 = arith.addf %83, %69 : vector<64x32xf32>
    %c0_53 = arith.constant 0 : index
    %c0_54 = arith.constant 0 : index
    %85 = vector.load %arg10[%c0_53, %c0_54] : memref<1x32xf32, #tpu.memory_space<vmem>>, vector<1x32xf32>
    %86 = vector.broadcast %85 : vector<1x32xf32> to vector<64x32xf32>
    %87 = arith.mulf %84, %86 : vector<64x32xf32>
    %c0_55 = arith.constant 0 : index
    %c0_56 = arith.constant 0 : index
    %88 = vector.load %arg11[%c0_55, %c0_56] : memref<1x32xf32, #tpu.memory_space<vmem>>, vector<1x32xf32>
    %89 = vector.broadcast %88 : vector<1x32xf32> to vector<64x32xf32>
    %90 = arith.addf %87, %89 : vector<64x32xf32>
    %91 = vector.shape_cast %90 : vector<64x32xf32> to vector<16x128xf32>
    %c0_57 = arith.constant 0 : index
    %c0_58 = arith.constant 0 : index
    %92 = vector.load %arg13[%c0_57, %c0_58] : memref<16x128xf32, #tpu.memory_space<vmem>>, vector<16x128xf32>
    tpu.vector_store %arg13[%c0_57, %c0_58], %91 {strides = array<i32>} : memref<16x128xf32, #tpu.memory_space<vmem>>, vector<16x128xf32>,
    return
  }
  func.func @transform_0(%arg0: i32) -> (i32, i32) {
    %c0_i32 = arith.constant 0 : i32
    %c0_i32_0 = arith.constant 0 : i32
    return %arg0, %c0_i32 : i32, i32
  }
  func.func @transform_1(%arg0: i32) -> (i32, i32) {
    %c0_i32 = arith.constant 0 : i32
    %c0_i32_0 = arith.constant 0 : i32
    %c0_i32_1 = arith.constant 0 : i32
    return %c0_i32, %c0_i32_0 : i32, i32
  }
  func.func @transform_2(%arg0: i32) -> (i32, i32) {
    %c0_i32 = arith.constant 0 : i32
    %c0_i32_0 = arith.constant 0 : i32
    %c0_i32_1 = arith.constant 0 : i32
    return %c0_i32, %c0_i32_0 : i32, i32
  }
  func.func @transform_3(%arg0: i32) -> (i32, i32) {
    %c0_i32 = arith.constant 0 : i32
    %c0_i32_0 = arith.constant 0 : i32
    %c0_i32_1 = arith.constant 0 : i32
    return %c0_i32, %c0_i32_0 : i32, i32
  }
  func.func @transform_4(%arg0: i32) -> (i32, i32) {
    %c0_i32 = arith.constant 0 : i32
    %c0_i32_0 = arith.constant 0 : i32
    %c0_i32_1 = arith.constant 0 : i32
    return %c0_i32, %c0_i32_0 : i32, i32
  }
  func.func @transform_5(%arg0: i32) -> (i32, i32) {
    %c0_i32 = arith.constant 0 : i32
    %c0_i32_0 = arith.constant 0 : i32
    %c0_i32_1 = arith.constant 0 : i32
    return %c0_i32, %c0_i32_0 : i32, i32
  }
  func.func @transform_6(%arg0: i32) -> (i32, i32) {
    %c0_i32 = arith.constant 0 : i32
    %c0_i32_0 = arith.constant 0 : i32
    %c0_i32_1 = arith.constant 0 : i32
    return %c0_i32, %c0_i32_0 : i32, i32
  }
  func.func @transform_7(%arg0: i32) -> (i32, i32) {
    %c0_i32 = arith.constant 0 : i32
    %c0_i32_0 = arith.constant 0 : i32
    %c0_i32_1 = arith.constant 0 : i32
    return %c0_i32, %c0_i32_0 : i32, i32
  }
  func.func @transform_8(%arg0: i32) -> (i32, i32) {
    %c0_i32 = arith.constant 0 : i32
    %c0_i32_0 = arith.constant 0 : i32
    %c0_i32_1 = arith.constant 0 : i32
    return %c0_i32, %c0_i32_0 : i32, i32
  }
  func.func @transform_9(%arg0: i32) -> (i32, i32) {
    %c0_i32 = arith.constant 0 : i32
    %c0_i32_0 = arith.constant 0 : i32
    %c0_i32_1 = arith.constant 0 : i32
    return %c0_i32, %c0_i32_0 : i32, i32
  }
  func.func @transform_10(%arg0: i32) -> (i32, i32) {
    %c0_i32 = arith.constant 0 : i32
    %c0_i32_0 = arith.constant 0 : i32
    %c0_i32_1 = arith.constant 0 : i32
    return %c0_i32, %c0_i32_0 : i32, i32
  }
  func.func @transform_11(%arg0: i32) -> (i32, i32, i32) {
    %c0_i32 = arith.constant 0 : i32
    %c0_i32_0 = arith.constant 0 : i32
    %c0_i32_1 = arith.constant 0 : i32
    %c0_i32_2 = arith.constant 0 : i32
    return %c0_i32, %c0_i32_0, %c0_i32_1 : i32, i32, i32
  }
  func.func @transform_12(%arg0: i32) -> (i32, i32) {
    %c0_i32 = arith.constant 0 : i32
    %c0_i32_0 = arith.constant 0 : i32
    return %arg0, %c0_i32 : i32, i32
  }
}

module attributes {stable_mosaic.version = 11 : i64} {
  func.func @_attention_cnn_kernel(%arg0: i32, %arg1: memref<64x32xf32, #tpu.memory_space<vmem>>, %arg2: memref<32x96xbf16, #tpu.memory_space<vmem>>, %arg3: memref<1x96xf32, #tpu.memory_space<vmem>>, %arg4: memref<32x32xbf16, #tpu.memory_space<vmem>>, %arg5: memref<1x32xf32, #tpu.memory_space<vmem>>, %arg6: memref<32x128xbf16, #tpu.memory_space<vmem>>, %arg7: memref<1x128xf32, #tpu.memory_space<vmem>>, %arg8: memref<128x32xbf16, #tpu.memory_space<vmem>>, %arg9: memref<1x32xf32, #tpu.memory_space<vmem>>, %arg10: memref<1x32xf32, #tpu.memory_space<vmem>>, %arg11: memref<1x32xf32, #tpu.memory_space<vmem>>, %arg12: memref<4x1x32xf32, #tpu.memory_space<vmem>>, %arg13: memref<64x32xf32, #tpu.memory_space<vmem>>, %arg14: memref<1x256x32xbf16, #tpu.memory_space<vmem>>, %arg15: memref<1x64x32xbf16, #tpu.memory_space<vmem>>, %arg16: memref<1x64x32xbf16, #tpu.memory_space<vmem>>, %arg17: memref<1x64x32xbf16, #tpu.memory_space<vmem>>) attributes {dimension_semantics = [#tpu.dimension_semantics<parallel>], iteration_bounds = array<i64: 2>, scalar_prefetch = 0 : i64, scratch_operands = 4 : i64, tpu.core_type = #tpu.core_type<tc>, window_params = [{transform_indices = @transform_0, window_bounds = array<i64: 64, 32>}, {pipeline_mode = #tpu.pipeline_mode<synchronous>, transform_indices = @transform_1, window_bounds = array<i64: 32, 96>}, {pipeline_mode = #tpu.pipeline_mode<synchronous>, transform_indices = @transform_2, window_bounds = array<i64: 1, 96>}, {pipeline_mode = #tpu.pipeline_mode<synchronous>, transform_indices = @transform_3, window_bounds = array<i64: 32, 32>}, {pipeline_mode = #tpu.pipeline_mode<synchronous>, transform_indices = @transform_4, window_bounds = array<i64: 1, 32>}, {pipeline_mode = #tpu.pipeline_mode<synchronous>, transform_indices = @transform_5, window_bounds = array<i64: 32, 128>}, {pipeline_mode = #tpu.pipeline_mode<synchronous>, transform_indices = @transform_6, window_bounds = array<i64: 1, 128>}, {pipeline_mode = #tpu.pipeline_mode<synchronous>, transform_indices = @transform_7, window_bounds = array<i64: 128, 32>}, {pipeline_mode = #tpu.pipeline_mode<synchronous>, transform_indices = @transform_8, window_bounds = array<i64: 1, 32>}, {pipeline_mode = #tpu.pipeline_mode<synchronous>, transform_indices = @transform_9, window_bounds = array<i64: 1, 32>}, {pipeline_mode = #tpu.pipeline_mode<synchronous>, transform_indices = @transform_10, window_bounds = array<i64: 1, 32>}, {pipeline_mode = #tpu.pipeline_mode<synchronous>, transform_indices = @transform_11, window_bounds = array<i64: 4, 1, 32>}, {transform_indices = @transform_12, window_bounds = array<i64: 64, 32>}]} {
    %c0 = arith.constant 0 : index
    %c0_0 = arith.constant 0 : index
    %0 = vector.load %arg1[%c0, %c0_0] : memref<64x32xf32, #tpu.memory_space<vmem>>, vector<64x32xf32>
    %1 = arith.truncf %0 : vector<64x32xf32> to vector<64x32xbf16>
    %c0_1 = arith.constant 0 : index
    %c0_2 = arith.constant 0 : index
    %2 = vector.load %arg2[%c0_1, %c0_2] : memref<32x96xbf16, #tpu.memory_space<vmem>>, vector<32x96xbf16>
    %cst = arith.constant dense<0.000000e+00> : vector<64x96xf32>
    %3 = tpu.matmul %1, %2, %cst {dimension_numbers = #tpu.dot_dimension_numbers<[1], [0], [0], [1], [0, 0, 1, 1], [], []>} : vector<64x32xbf16>, vector<32x96xbf16>, vector<64x96xf32> -> vector<64x96xf32>
    %c0_3 = arith.constant 0 : index
    %c0_4 = arith.constant 0 : index
    %4 = vector.load %arg3[%c0_3, %c0_4] : memref<1x96xf32, #tpu.memory_space<vmem>>, vector<1x96xf32>
    %5 = vector.broadcast %4 : vector<1x96xf32> to vector<64x96xf32>
    %6 = arith.addf %3, %5 : vector<64x96xf32>
    %7 = vector.extract_strided_slice %6 {offsets = [0, 0], sizes = [64, 32], strides = [1, 1]} : vector<64x96xf32> to vector<64x32xf32>
    %8 = vector.extract_strided_slice %6 {offsets = [0, 32], sizes = [64, 32], strides = [1, 1]} : vector<64x96xf32> to vector<64x32xf32>
    %9 = vector.extract_strided_slice %6 {offsets = [0, 64], sizes = [64, 32], strides = [1, 1]} : vector<64x96xf32> to vector<64x32xf32>
    %c0_5 = arith.constant 0 : index
    %c0_6 = arith.constant 0 : index
    %c0_7 = arith.constant 0 : index
    %10 = vector.load %arg12[%c0_5, %c0_6, %c0_7] : memref<4x1x32xf32, #tpu.memory_space<vmem>>, vector<4x1x32xf32>
    %11 = vector.shape_cast %7 : vector<64x32xf32> to vector<1x1x64x32xf32>
    %12 = vector.shape_cast %10 : vector<4x1x32xf32> to vector<1x4x1x32xf32>
    %13 = vector.broadcast %11 : vector<1x1x64x32xf32> to vector<1x4x64x32xf32>
    %14 = vector.broadcast %12 : vector<1x4x1x32xf32> to vector<1x4x64x32xf32>
    %15 = arith.mulf %13, %14 : vector<1x4x64x32xf32>
    %16 = vector.shape_cast %15 : vector<1x4x64x32xf32> to vector<1x256x32xf32>
    %17 = arith.truncf %16 : vector<1x256x32xf32> to vector<1x256x32xbf16>
    %c0_8 = arith.constant 0 : index
    %c0_9 = arith.constant 0 : index
    %c0_10 = arith.constant 0 : index
    %18 = vector.load %arg14[%c0_8, %c0_9, %c0_10] : memref<1x256x32xbf16, #tpu.memory_space<vmem>>, vector<1x256x32xbf16>
    tpu.vector_store %arg14[%c0_8, %c0_9, %c0_10], %17 {strides = array<i32>} : memref<1x256x32xbf16, #tpu.memory_space<vmem>>, vector<1x256x32xbf16>,
    %19 = vector.shape_cast %8 : vector<64x32xf32> to vector<1x64x32xf32>
    %20 = arith.truncf %19 : vector<1x64x32xf32> to vector<1x64x32xbf16>
    %c0_11 = arith.constant 0 : index
    %c0_12 = arith.constant 0 : index
    %c0_13 = arith.constant 0 : index
    %21 = vector.load %arg15[%c0_11, %c0_12, %c0_13] : memref<1x64x32xbf16, #tpu.memory_space<vmem>>, vector<1x64x32xbf16>
    tpu.vector_store %arg15[%c0_11, %c0_12, %c0_13], %20 {strides = array<i32>} : memref<1x64x32xbf16, #tpu.memory_space<vmem>>, vector<1x64x32xbf16>,
    %22 = vector.shape_cast %9 : vector<64x32xf32> to vector<1x64x32xf32>
    %23 = arith.truncf %22 : vector<1x64x32xf32> to vector<1x64x32xbf16>
    %c0_14 = arith.constant 0 : index
    %c0_15 = arith.constant 0 : index
    %c0_16 = arith.constant 0 : index
    %24 = vector.load %arg16[%c0_14, %c0_15, %c0_16] : memref<1x64x32xbf16, #tpu.memory_space<vmem>>, vector<1x64x32xbf16>
    tpu.vector_store %arg16[%c0_14, %c0_15, %c0_16], %23 {strides = array<i32>} : memref<1x64x32xbf16, #tpu.memory_space<vmem>>, vector<1x64x32xbf16>,
    %c0_i32 = arith.constant 0 : i32
    %25 = arith.index_cast %c0_i32 : i32 to index
    %c0_17 = arith.constant 0 : index
    %c0_18 = arith.constant 0 : index
    %26 = vector.load %arg14[%25, %c0_17, %c0_18] : memref<1x256x32xbf16, #tpu.memory_space<vmem>>, vector<1x256x32xbf16>
    %27 = vector.shape_cast %26 : vector<1x256x32xbf16> to vector<256x32xbf16>
    %28 = arith.index_cast %c0_i32 : i32 to index
    %c0_19 = arith.constant 0 : index
    %c0_20 = arith.constant 0 : index
    %29 = vector.load %arg15[%28, %c0_19, %c0_20] : memref<1x64x32xbf16, #tpu.memory_space<vmem>>, vector<1x64x32xbf16>
    %30 = vector.shape_cast %29 : vector<1x64x32xbf16> to vector<64x32xbf16>
    %31 = arith.index_cast %c0_i32 : i32 to index
    %c0_21 = arith.constant 0 : index
    %c0_22 = arith.constant 0 : index
    %32 = vector.load %arg16[%31, %c0_21, %c0_22] : memref<1x64x32xbf16, #tpu.memory_space<vmem>>, vector<1x64x32xbf16>
    %33 = vector.shape_cast %32 : vector<1x64x32xbf16> to vector<64x32xbf16>
    %cst_23 = arith.constant dense<0.000000e+00> : vector<256x64xf32>
    %34 = tpu.matmul %27, %30, %cst_23 {dimension_numbers = #tpu.dot_dimension_numbers<[1], [1], [0], [0], [0, 0, 1, 0], [], []>} : vector<256x32xbf16>, vector<64x32xbf16>, vector<256x64xf32> -> vector<256x64xf32>
    %cst_24 = arith.constant dense<0xFF800000> : vector<256xf32>
    %35 = vector.multi_reduction <maximumf>, %34, %cst_24 [1] : vector<256x64xf32> to vector<256xf32>
    %36 = vector.shape_cast %35 : vector<256xf32> to vector<256x1xf32>
    %37 = vector.broadcast %36 : vector<256x1xf32> to vector<256x64xf32>
    %38 = arith.subf %34, %37 : vector<256x64xf32>
    %39 = math.exp %38 : vector<256x64xf32>
    %cst_25 = arith.constant dense<0.000000e+00> : vector<256xf32>
    %40 = vector.multi_reduction <add>, %39, %cst_25 [1] : vector<256x64xf32> to vector<256xf32>
    %41 = vector.shape_cast %40 : vector<256xf32> to vector<256x1xf32>
    %42 = tpu.reciprocal %41 {approx = true} : vector<256x1xf32> -> vector<256x1xf32>
    %43 = vector.broadcast %42 : vector<256x1xf32> to vector<256x64xf32>
    %44 = arith.mulf %39, %43 : vector<256x64xf32>
    %45 = arith.truncf %44 : vector<256x64xf32> to vector<256x64xbf16>
    %cst_26 = arith.constant dense<0.000000e+00> : vector<256x32xf32>
    %46 = tpu.matmul %45, %33, %cst_26 {dimension_numbers = #tpu.dot_dimension_numbers<[1], [0], [0], [1], [0, 0, 1, 1], [], []>} : vector<256x64xbf16>, vector<64x32xbf16>, vector<256x32xf32> -> vector<256x32xf32>
    %47 = vector.shape_cast %46 : vector<256x32xf32> to vector<4x64x32xf32>
    %48 = vector.broadcast %10 : vector<4x1x32xf32> to vector<4x64x32xf32>
    %49 = arith.mulf %47, %48 : vector<4x64x32xf32>
    %cst_27 = arith.constant dense<0.000000e+00> : vector<64x32xf32>
    %50 = vector.multi_reduction <add>, %49, %cst_27 [0] : vector<4x64x32xf32> to vector<64x32xf32>
    %51 = arith.truncf %50 : vector<64x32xf32> to vector<64x32xbf16>
    %52 = arith.index_cast %c0_i32 : i32 to index
    %c0_28 = arith.constant 0 : index
    %c0_29 = arith.constant 0 : index
    %53 = vector.load %arg17[%52, %c0_28, %c0_29] : memref<1x64x32xbf16, #tpu.memory_space<vmem>>, vector<1x64x32xbf16>
    %54 = vector.shape_cast %53 : vector<1x64x32xbf16> to vector<64x32xbf16>
    %55 = vector.shape_cast %51 : vector<64x32xbf16> to vector<1x64x32xbf16>
    tpu.vector_store %arg17[%52, %c0_28, %c0_29], %55 {strides = array<i32>} : memref<1x64x32xbf16, #tpu.memory_space<vmem>>, vector<1x64x32xbf16>,
    %c1_i32 = arith.constant 1 : i32
    %c0_30 = arith.constant 0 : index
    %c0_31 = arith.constant 0 : index
    %c0_32 = arith.constant 0 : index
    %56 = vector.load %arg17[%c0_30, %c0_31, %c0_32] : memref<1x64x32xbf16, #tpu.memory_space<vmem>>, vector<1x64x32xbf16>
    %57 = vector.shape_cast %56 : vector<1x64x32xbf16> to vector<64x32xbf16>
    %c0_33 = arith.constant 0 : index
    %c0_34 = arith.constant 0 : index
    %58 = vector.load %arg4[%c0_33, %c0_34] : memref<32x32xbf16, #tpu.memory_space<vmem>>, vector<32x32xbf16>
    %cst_35 = arith.constant dense<0.000000e+00> : vector<64x32xf32>
    %59 = tpu.matmul %57, %58, %cst_35 {dimension_numbers = #tpu.dot_dimension_numbers<[1], [0], [0], [1], [0, 0, 1, 1], [], []>} : vector<64x32xbf16>, vector<32x32xbf16>, vector<64x32xf32> -> vector<64x32xf32>
    %c0_36 = arith.constant 0 : index
    %c0_37 = arith.constant 0 : index
    %60 = vector.load %arg5[%c0_36, %c0_37] : memref<1x32xf32, #tpu.memory_space<vmem>>, vector<1x32xf32>
    %61 = vector.broadcast %60 : vector<1x32xf32> to vector<64x32xf32>
    %62 = arith.addf %59, %61 : vector<64x32xf32>
    %63 = arith.addf %62, %0 : vector<64x32xf32>
    %c0_38 = arith.constant 0 : index
    %c0_39 = arith.constant 0 : index
    %64 = vector.load %arg10[%c0_38, %c0_39] : memref<1x32xf32, #tpu.memory_space<vmem>>, vector<1x32xf32>
    %65 = vector.broadcast %64 : vector<1x32xf32> to vector<64x32xf32>
    %66 = arith.mulf %63, %65 : vector<64x32xf32>
    %c0_40 = arith.constant 0 : index
    %c0_41 = arith.constant 0 : index
    %67 = vector.load %arg11[%c0_40, %c0_41] : memref<1x32xf32, #tpu.memory_space<vmem>>, vector<1x32xf32>
    %68 = vector.broadcast %67 : vector<1x32xf32> to vector<64x32xf32>
    %69 = arith.addf %66, %68 : vector<64x32xf32>
    %70 = arith.truncf %69 : vector<64x32xf32> to vector<64x32xbf16>
    %c0_42 = arith.constant 0 : index
    %c0_43 = arith.constant 0 : index
    %71 = vector.load %arg6[%c0_42, %c0_43] : memref<32x128xbf16, #tpu.memory_space<vmem>>, vector<32x128xbf16>
    %cst_44 = arith.constant dense<0.000000e+00> : vector<64x128xf32>
    %72 = tpu.matmul %70, %71, %cst_44 {dimension_numbers = #tpu.dot_dimension_numbers<[1], [0], [0], [1], [0, 0, 1, 1], [], []>} : vector<64x32xbf16>, vector<32x128xbf16>, vector<64x128xf32> -> vector<64x128xf32>
    %c0_45 = arith.constant 0 : index
    %c0_46 = arith.constant 0 : index
    %73 = vector.load %arg7[%c0_45, %c0_46] : memref<1x128xf32, #tpu.memory_space<vmem>>, vector<1x128xf32>
    %74 = vector.broadcast %73 : vector<1x128xf32> to vector<64x128xf32>
    %75 = arith.addf %72, %74 : vector<64x128xf32>
    %cst_47 = arith.constant 0.000000e+00 : f32
    %76 = vector.broadcast %cst_47 : f32 to vector<64x128xf32>
    %77 = arith.maximumf %75, %76 : vector<64x128xf32>
    %78 = arith.truncf %77 : vector<64x128xf32> to vector<64x128xbf16>
    %c0_48 = arith.constant 0 : index
    %c0_49 = arith.constant 0 : index
    %79 = vector.load %arg8[%c0_48, %c0_49] : memref<128x32xbf16, #tpu.memory_space<vmem>>, vector<128x32xbf16>
    %cst_50 = arith.constant dense<0.000000e+00> : vector<64x32xf32>
    %80 = tpu.matmul %78, %79, %cst_50 {dimension_numbers = #tpu.dot_dimension_numbers<[1], [0], [0], [1], [0, 0, 1, 1], [], []>} : vector<64x128xbf16>, vector<128x32xbf16>, vector<64x32xf32> -> vector<64x32xf32>
    %c0_51 = arith.constant 0 : index
    %c0_52 = arith.constant 0 : index
    %81 = vector.load %arg9[%c0_51, %c0_52] : memref<1x32xf32, #tpu.memory_space<vmem>>, vector<1x32xf32>
    %82 = vector.broadcast %81 : vector<1x32xf32> to vector<64x32xf32>
    %83 = arith.addf %80, %82 : vector<64x32xf32>
    %84 = arith.addf %83, %69 : vector<64x32xf32>
    %c0_53 = arith.constant 0 : index
    %c0_54 = arith.constant 0 : index
    %85 = vector.load %arg10[%c0_53, %c0_54] : memref<1x32xf32, #tpu.memory_space<vmem>>, vector<1x32xf32>
    %86 = vector.broadcast %85 : vector<1x32xf32> to vector<64x32xf32>
    %87 = arith.mulf %84, %86 : vector<64x32xf32>
    %c0_55 = arith.constant 0 : index
    %c0_56 = arith.constant 0 : index
    %88 = vector.load %arg11[%c0_55, %c0_56] : memref<1x32xf32, #tpu.memory_space<vmem>>, vector<1x32xf32>
    %89 = vector.broadcast %88 : vector<1x32xf32> to vector<64x32xf32>
    %90 = arith.addf %87, %89 : vector<64x32xf32>
    %c0_57 = arith.constant 0 : index
    %c0_58 = arith.constant 0 : index
    %91 = vector.load %arg13[%c0_57, %c0_58] : memref<64x32xf32, #tpu.memory_space<vmem>>, vector<64x32xf32>
    tpu.vector_store %arg13[%c0_57, %c0_58], %90 {strides = array<i32>} : memref<64x32xf32, #tpu.memory_space<vmem>>, vector<64x32xf32>,
    return
  }
  func.func @transform_0(%arg0: i32) -> (i32, i32) {
    %c0_i32 = arith.constant 0 : i32
    %c0_i32_0 = arith.constant 0 : i32
    return %arg0, %c0_i32 : i32, i32
  }
  func.func @transform_1(%arg0: i32) -> (i32, i32) {
    %c0_i32 = arith.constant 0 : i32
    %c0_i32_0 = arith.constant 0 : i32
    %c0_i32_1 = arith.constant 0 : i32
    return %c0_i32, %c0_i32_0 : i32, i32
  }
  func.func @transform_2(%arg0: i32) -> (i32, i32) {
    %c0_i32 = arith.constant 0 : i32
    %c0_i32_0 = arith.constant 0 : i32
    %c0_i32_1 = arith.constant 0 : i32
    return %c0_i32, %c0_i32_0 : i32, i32
  }
  func.func @transform_3(%arg0: i32) -> (i32, i32) {
    %c0_i32 = arith.constant 0 : i32
    %c0_i32_0 = arith.constant 0 : i32
    %c0_i32_1 = arith.constant 0 : i32
    return %c0_i32, %c0_i32_0 : i32, i32
  }
  func.func @transform_4(%arg0: i32) -> (i32, i32) {
    %c0_i32 = arith.constant 0 : i32
    %c0_i32_0 = arith.constant 0 : i32
    %c0_i32_1 = arith.constant 0 : i32
    return %c0_i32, %c0_i32_0 : i32, i32
  }
  func.func @transform_5(%arg0: i32) -> (i32, i32) {
    %c0_i32 = arith.constant 0 : i32
    %c0_i32_0 = arith.constant 0 : i32
    %c0_i32_1 = arith.constant 0 : i32
    return %c0_i32, %c0_i32_0 : i32, i32
  }
  func.func @transform_6(%arg0: i32) -> (i32, i32) {
    %c0_i32 = arith.constant 0 : i32
    %c0_i32_0 = arith.constant 0 : i32
    %c0_i32_1 = arith.constant 0 : i32
    return %c0_i32, %c0_i32_0 : i32, i32
  }
  func.func @transform_7(%arg0: i32) -> (i32, i32) {
    %c0_i32 = arith.constant 0 : i32
    %c0_i32_0 = arith.constant 0 : i32
    %c0_i32_1 = arith.constant 0 : i32
    return %c0_i32, %c0_i32_0 : i32, i32
  }
  func.func @transform_8(%arg0: i32) -> (i32, i32) {
    %c0_i32 = arith.constant 0 : i32
    %c0_i32_0 = arith.constant 0 : i32
    %c0_i32_1 = arith.constant 0 : i32
    return %c0_i32, %c0_i32_0 : i32, i32
  }
  func.func @transform_9(%arg0: i32) -> (i32, i32) {
    %c0_i32 = arith.constant 0 : i32
    %c0_i32_0 = arith.constant 0 : i32
    %c0_i32_1 = arith.constant 0 : i32
    return %c0_i32, %c0_i32_0 : i32, i32
  }
  func.func @transform_10(%arg0: i32) -> (i32, i32) {
    %c0_i32 = arith.constant 0 : i32
    %c0_i32_0 = arith.constant 0 : i32
    %c0_i32_1 = arith.constant 0 : i32
    return %c0_i32, %c0_i32_0 : i32, i32
  }
  func.func @transform_11(%arg0: i32) -> (i32, i32, i32) {
    %c0_i32 = arith.constant 0 : i32
    %c0_i32_0 = arith.constant 0 : i32
    %c0_i32_1 = arith.constant 0 : i32
    %c0_i32_2 = arith.constant 0 : i32
    return %c0_i32, %c0_i32_0, %c0_i32_1 : i32, i32, i32
  }
  func.func @transform_12(%arg0: i32) -> (i32, i32) {
    %c0_i32 = arith.constant 0 : i32
    %c0_i32_0 = arith.constant 0 : i32
    return %arg0, %c0_i32 : i32, i32
  }
}

</mosaic_0001>

<bundles_post_ra>
// kernel: tpu_custom_call.1
= control target key start
LH: loop header
LB: loop body
LE: loop exit
PB: predicated region body
PF: predicated region fallthrough
CT: control target
= control target key end

     0   :  { %s2596_s21 = smov 0   ;;  %s3305_s0 = inlined_call_operand.vmem [shape: f32[128,32], index: 0, kind: input, shape index: {}]   ;;  %s3306_s1 = inlined_call_operand.vmem [shape: bf16[32,96], index: 1, kind: input, shape index: {}]   ;;  %s3307_s2 = inlined_call_operand.vmem [shape: f32[1,96], index: 2, kind: input, shape index: {}]   ;;  %s3308_s3 = inlined_call_operand.vmem [shape: bf16[32,32], index: 3, kind: input, shape index: {}]   ;;  %s3309_s4 = inlined_call_operand.vmem [shape: f32[1,32], index: 4, kind: input, shape index: {}]   ;;  %s3310_s5 = inlined_call_operand.vmem [shape: bf16[32,128], index: 5, kind: input, shape index: {}]   ;;  %s3311_s6 = inlined_call_operand.vmem [shape: f32[1,128], index: 6, kind: input, shape index: {}]   ;;  %s3312_s7 = inlined_call_operand.vmem [shape: bf16[128,32], index: 7, kind: input, shape index: {}]   ;;  %s3313_s8 = inlined_call_operand.vmem [shape: f32[1,32], index: 8, kind: input, shape index: {}]   ;;  %s3314_s9 = inlined_call_operand.vmem [shape: f32[1,32], index: 9, kind: input, shape index: {}]   ;;  %s3315_s10 = inlined_call_operand.vmem [shape: f32[1,32], index: 10, kind: input, shape index: {}]   ;;  %s3316_s11 = inlined_call_operand.vmem [shape: f32[4,1,32], index: 11, kind: input, shape index: {}]   ;;  %s3317_s12 = inlined_call_operand.vmem [shape: f32[128,32], index: 12, kind: output, shape index: {}]  }
   0x1 LB: > { %s2064_s22 = sadd.s32 4294967295, %s2527_s21   ;;  %p2068_p0 = scmp.ge.s32.totalorder %s2527_s21, 1  ;;  %s2527_s21 = sphi %s2596_s21, %s22_s21  }
   0x2   : > { %p363_p1 = scmp.lt.s32.totalorder %s2527_s21, 3 }
   0x4   : > { %p364_p2 = pnand %p2068_p0, %p363_p1 }
   0x5   : > { %v2367_v0 = vld [vmem:[%s3306_s1] sm:$0xff] (!%p364_p2)   ;;  %s2069_s25 = sshll.u32 (!%p364_p2), %s2064_s22, 3  ;;  %v2368_v1 = vld [vmem:[%s3306_s1 + $0x8] sm:$0xff] (!%p364_p2)   ;;  %vm453_vm0 = vcmask (!%p364_p2), 261120   ;;  %s2529_s26 = smov (!%p364_p2), 96   ;;  %vm908_vm1 = vcmask (!%p364_p2), 523264  }
   0x6   : > { %367 = sbr.rel (%p364_p2) target bundleno = 1938 (0x792), region = 68  ;;  %p406_p3 = scmp.lt.s32.totalorder (!%p364_p2), %s2069_s25, 15  ;;  %2213 = vmatprep.subr.bf16.mxu1 (!%p364_p2), %v2367_v0  ;;  %v2073_v14 = vld [vmem:[%s3307_s2] ss:$0 sm:$0xff] (!%p364_p2)  ;;  %v2643_v18 = vld [vmem:[%s3316_s11 + $0x1] ss:$0 sm:$0xff] (!%p364_p2) }
   0x7   : > { %2214 = vmatpush3.bf16.msra.mxu1 (!%p364_p2), %v2367_v0  ;;  %v2638_v17 = vld [vmem:[%s3316_s11] ss:$0 sm:$0xff] (!%p364_p2)  ;;  %v2648_v20 = vld [vmem:[%s3316_s11 + $0x2] ss:$0 sm:$0xff] (!%p364_p2)  ;;  %v2653_v21 = vld [vmem:[%s3316_s11 + $0x3] ss:$0 sm:$0xff] (!%p364_p2) }
   0x8   : > { %2215 = vmatprep.subr.bf16.mxu1 (!%p364_p2), %v2368_v1  ;;  %s2530_s27 = smov (!%p364_p2), 64  }
   0xb   : > { %2216 = vmatpush3.bf16.msra.mxu1 (!%p364_p2), %v2368_v1 }
   0xd   : > { %s3319_s25 = smov (!%p406_p3, %s2069_s25), 15 }
   0xe   : > { %s2070_s28 = sshll.u32 %s3319_s25, 3 }
   0xf   : > { %s2618_s13 = scalar_lea.vmem %s3305_s0, %s2070_s28  ;;  %s3264_s30 = scalar_lea.vmem %s3317_s12, %s2070_s28 }
  0x10   : > { %v418_v2 = vld [vmem:[%s2618_s13] sm:$0xff]  ;;  %v419_v3 = vld [vmem:[%s2618_s13 + $0x8] sm:$0xff]  ;;  %v420_v4 = vld [vmem:[%s2618_s13 + $0x10] sm:$0xff] }
  0x11   : > { %v426_v5 = vpack.c.bf16 %v419_v3, %v418_v2  ;;  %v421_v6 = vld [vmem:[%s2618_s13 + $0x18] sm:$0xff]  ;;  %v422_v7 = vld [vmem:[%s2618_s13 + $0x20] sm:$0xff]  ;;  %v423_v8 = vld [vmem:[%s2618_s13 + $0x28] sm:$0xff] }
  0x12   : > { %v427_v9 = vpack.c.bf16 %v421_v6, %v420_v4  ;;  %v428_v10 = vpack.c.bf16 %v423_v8, %v422_v7  ;;  %v424_v11 = vld [vmem:[%s2618_s13 + $0x30] sm:$0xff]  ;;  %v425_v12 = vld [vmem:[%s2618_s13 + $0x38] sm:$0xff] }
  0x13   : > { %2217 = vmatprep.mubr.msk.bf16.mxu1 %vm453_vm0, %v426_v5  ;;  %v429_v13 = vpack.c.bf16 %v425_v12, %v424_v11 }
  0x14   : > { %2218 = vmatmul.mubr.msk.bf16.vlgmr.msra.gmra.mrb[0].mxu1 %vm453_vm0, %v427_v9 }
  0x15   : > { %2221 = vmatprep.mubr.msk.bf16.mxu1 %vm453_vm0, %v428_v10 }
  0x1c   : > { %2222 = vmatmul.mubr.msk.bf16.gmra.mrb[4].mxu1 %vm453_vm0, %v429_v13 }
  0xe7   : > { %v2219_v15 = vpop.f32.mrb[0].mxu1 }
  0xe8   : > { %v509_v16 = vadd.f32 %v2219_v15, %v2073_v14  ;;  %v500_v19 = vpop.f32.mrb[1].mxu1 }
  0xe9   : > { %v501_v22 = vadd.f32 %v2073_v14, %v500_v19  ;;  %v2220_v23 = vpop.f32.mrb[2].mxu1 }
  0xea   : > { %v503_v24 = vpop.f32.mrb[3].mxu1  ;;  %v561_v25 = vmul.f32 %v2638_v17, %v509_v16  ;;  %v569_v26 = vmul.f32 %v2643_v18, %v509_v16  ;;  %v577_v27 = vmul.f32 %v2648_v20, %v509_v16  ;;  %v585_v28 = vmul.f32 %v2653_v21, %v509_v16 }
  0xeb   : > { %v512_v29 = vadd.f32 %v2220_v23, %v2073_v14  ;;  %v504_v30 = vadd.f32 %v2073_v14, %v503_v24  ;;  %v559_v31 = vmul.f32 %v2638_v17, %v501_v22  ;;  %v567_v32 = vmul.f32 %v2643_v18, %v501_v22 }
  0xec   : > { %v575_v33 = vmul.f32 %v2648_v20, %v501_v22  ;;  %v583_v34 = vmul.f32 %v2653_v21, %v501_v22 }
  0xed   : > { %v562_v35 = vmul.f32 %v2638_v17, %v512_v29  ;;  %v570_v36 = vmul.f32 %v2643_v18, %v512_v29  ;;  %v578_v37 = vmul.f32 %v2648_v20, %v512_v29  ;;  %v586_v38 = vmul.f32 %v2653_v21, %v512_v29 }
  0xee   : > { %v560_v39 = vmul.f32 %v2638_v17, %v504_v30  ;;  %v568_v40 = vmul.f32 %v2643_v18, %v504_v30  ;;  %v576_v41 = vmul.f32 %v2648_v20, %v504_v30  ;;  %v584_v42 = vmul.f32 %v2653_v21, %v504_v30 }
  0xef   : > { %v2223_v43 = vpop.f32.mrb[4].mxu1  ;;  %v592_v44 = vpack.c.bf16 %v562_v35, %v561_v25  ;;  %v596_v45 = vpack.c.bf16 %v570_v36, %v569_v26  ;;  %v600_v46 = vpack.c.bf16 %v578_v37, %v577_v27  ;;  %v604_v47 = vpack.c.bf16 %v586_v38, %v585_v28 }
  0xf0   : > { %v516_v48 = vpop.f32.mrb[5].mxu1  ;;  %v591_v49 = vpack.c.bf16 %v560_v39, %v559_v31  ;;  %v595_v50 = vpack.c.bf16 %v568_v40, %v567_v32  ;;  %v599_v51 = vpack.c.bf16 %v576_v41, %v575_v33  ;;  %v603_v52 = vpack.c.bf16 %v584_v42, %v583_v34 }
  0xf1   : > { %v2224_v53 = vpop.f32.mrb[6].mxu1  ;;  %608 = vst.msk [vmem:[#allocation2 + $0x8] sm:$0xff] %vm453_vm0, %v592_v44  ;;  %612 = vst.msk [vmem:[#allocation2 + $0x28] sm:$0xff] %vm453_vm0, %v596_v45  ;;  %v525_v54 = vadd.f32 %v2223_v43, %v2073_v14  ;;  %v623_v55 = vpack.c.bf16 %v504_v30, %v501_v22  ;;  %v517_v58 = vadd.f32 %v2073_v14, %v516_v48 }
  0xf2   : > { %616 = vst.msk [vmem:[#allocation2 + $0x48] sm:$0xff] %vm453_vm0, %v600_v46  ;;  %620 = vst.msk [vmem:[#allocation2 + $0x68] sm:$0xff] %vm453_vm0, %v604_v47  ;;  %v528_v56 = vadd.f32 %v2224_v53, %v2073_v14  ;;  %v519_v57 = vpop.f32.mrb[7].mxu1  ;;  %v624_v60 = vpack.c.bf16 %v512_v29, %v509_v16 }
  0xf3   : > { %607 = vst.msk [vmem:[#allocation2] sm:$0xff] %vm453_vm0, %v591_v49  ;;  %611 = vst.msk [vmem:[#allocation2 + $0x20] sm:$0xff] %vm453_vm0, %v595_v50  ;;  %v520_v59 = vadd.f32 %v2073_v14, %v519_v57  ;;  %v565_v61 = vmul.f32 %v2638_v17, %v525_v54  ;;  %v573_v62 = vmul.f32 %v2643_v18, %v525_v54  ;;  %631 = vrot.lane.b32.xlu0 %v623_v55, %s2529_s26 }
  0xf4   : > { %615 = vst.msk [vmem:[#allocation2 + $0x40] sm:$0xff] %vm453_vm0, %v599_v51  ;;  %619 = vst.msk [vmem:[#allocation2 + $0x60] sm:$0xff] %vm453_vm0, %v603_v52  ;;  %v581_v63 = vmul.f32 %v2648_v20, %v525_v54  ;;  %v589_v0 = vmul.f32 %v2653_v21, %v525_v54  ;;  %v563_v1 = vmul.f32 %v2638_v17, %v517_v58 }
  0xf5   : > { %v571_v2 = vmul.f32 %v2643_v18, %v517_v58  ;;  %v579_v3 = vmul.f32 %v2648_v20, %v517_v58  ;;  %v587_v4 = vmul.f32 %v2653_v21, %v517_v58  ;;  %v566_v5 = vmul.f32 %v2638_v17, %v528_v56 }
  0xf6   : > { %v574_v6 = vmul.f32 %v2643_v18, %v528_v56  ;;  %v582_v7 = vmul.f32 %v2648_v20, %v528_v56  ;;  %v590_v8 = vmul.f32 %v2653_v21, %v528_v56  ;;  %v564_v9 = vmul.f32 %v2638_v17, %v520_v59 }
  0xf7   : > { %v572_v10 = vmul.f32 %v2643_v18, %v520_v59  ;;  %v580_v11 = vmul.f32 %v2648_v20, %v520_v59  ;;  %v588_v12 = vmul.f32 %v2653_v21, %v520_v59  ;;  %v594_v13 = vpack.c.bf16 %v566_v5, %v565_v61  ;;  %633 = vrot.lane.b32.xlu0 %v624_v60, %s2529_s26 }
  0xf8   : > { %v598_v14 = vpack.c.bf16 %v574_v6, %v573_v62  ;;  %v602_v15 = vpack.c.bf16 %v582_v7, %v581_v63  ;;  %v606_v16 = vpack.c.bf16 %v590_v8, %v589_v0  ;;  %v593_v19 = vpack.c.bf16 %v564_v9, %v563_v1  ;;  %v664_v40 = vld [vmem:[#allocation2 + $0x8] sm:$0xff] }
  0xf9   : > { %v597_v22 = vpack.c.bf16 %v572_v10, %v571_v2  ;;  %v601_v23 = vpack.c.bf16 %v580_v11, %v579_v3  ;;  %v605_v24 = vpack.c.bf16 %v588_v12, %v587_v4  ;;  %610 = vst.msk [vmem:[#allocation2 + $0x18] sm:$0xff] %vm453_vm0, %v594_v13  ;;  %v2701_v17 = vpack.c.bf16 %v520_v59, %v517_v58  ;;  %v668_v44 = vld [vmem:[#allocation2 + $0x28] sm:$0xff] }
  0xfa   : > { %614 = vst.msk [vmem:[#allocation2 + $0x38] sm:$0xff] %vm453_vm0, %v598_v14  ;;  %618 = vst.msk [vmem:[#allocation2 + $0x58] sm:$0xff] %vm453_vm0, %v602_v15  ;;  %v663_v18 = vld [vmem:[#allocation2] sm:$0xff]  ;;  %v2703_v20 = vpack.c.bf16 %v528_v56, %v525_v54  ;;  %v672_v48 = vld [vmem:[#allocation2 + $0x48] sm:$0xff] }
  0xfb   : > { %622 = vst.msk [vmem:[#allocation2 + $0x78] sm:$0xff] %vm453_vm0, %v606_v16  ;;  %609 = vst.msk [vmem:[#allocation2 + $0x10] sm:$0xff] %vm453_vm0, %v593_v19  ;;  %2233 = vmatprep.mubr.msk.bf16.mxu1 %vm453_vm0, %v663_v18  ;;  %635 = vrot.lane.b32.xlu1 %v2701_v17, %s2529_s26  ;;  %v667_v43 = vld [vmem:[#allocation2 + $0x20] sm:$0xff]  ;;  %v676_v52 = vld [vmem:[#allocation2 + $0x68] sm:$0xff] }
  0xfc   : > { %613 = vst.msk [vmem:[#allocation2 + $0x30] sm:$0xff] %vm453_vm0, %v597_v22  ;;  %617 = vst.msk [vmem:[#allocation2 + $0x50] sm:$0xff] %vm453_vm0, %v601_v23  ;;  %v671_v47 = vld [vmem:[#allocation2 + $0x40] sm:$0xff] }
  0xfd   : > { %621 = vst.msk [vmem:[#allocation2 + $0x70] sm:$0xff] %vm453_vm0, %v605_v24  ;;  %v675_v51 = vld [vmem:[#allocation2 + $0x60] sm:$0xff] }
  0xff   : > { %637 = vrot.lane.b32.xlu1 %v2703_v20, %s2529_s26 }
 0x100   : > { %v666_v42 = vld [vmem:[#allocation2 + $0x18] sm:$0xff] }
 0x101   : > { %v670_v46 = vld [vmem:[#allocation2 + $0x38] sm:$0xff] }
 0x102   : > { %v665_v41 = vld [vmem:[#allocation2 + $0x10] sm:$0xff]  ;;  %v674_v50 = vld [vmem:[#allocation2 + $0x58] sm:$0xff] }
 0x103   : > { %647 = vrot.lane.b32.xlu1 %v623_v55, %s2530_s27  ;;  %v669_v45 = vld [vmem:[#allocation2 + $0x30] sm:$0xff]  ;;  %v678_v54 = vld [vmem:[#allocation2 + $0x78] sm:$0xff] }
 0x104   : > { %v673_v49 = vld [vmem:[#allocation2 + $0x50] sm:$0xff] }
 0x105   : > { %v677_v53 = vld [vmem:[#allocation2 + $0x70] sm:$0xff] }
 0x107   : > { %649 = vrot.lane.b32.xlu1 %v624_v60, %s2530_s27 }
 0x165   : > { %v632_v21 = vpop.permute.xlu0 %631 }
 0x166   : > { %643 = vst.msk [vmem:[#allocation3] sm:$0xff] %vm453_vm0, %v632_v21 }
 0x169   : > { %v634_v25 = vpop.permute.xlu0 %633 }
 0x16a   : > { %644 = vst.msk [vmem:[#allocation3 + $0x8] sm:$0xff] %vm453_vm0, %v634_v25 }
 0x16d   : > { %v636_v26 = vpop.permute.xlu1 %635  ;;  %v679_v27 = vld [vmem:[#allocation3] sm:$0xff] }
 0x16e   : > { %645 = vst.msk [vmem:[#allocation3 + $0x10] sm:$0xff] %vm453_vm0, %v636_v26  ;;  %2353 = vmatprep.subr.msk.bf16.mxu1 %vm453_vm0, %v679_v27  ;;  %v736_v28 = vsel %vm453_vm0, %v679_v27, 0 }
 0x16f   : > { %2226 = vmatpush3.bf16.xpose.msra.mxu1 %v736_v28 }
 0x171   : > { %v638_v29 = vpop.permute.xlu1 %637  ;;  %v680_v30 = vld [vmem:[#allocation3 + $0x8] sm:$0xff] }
 0x172   : > { %646 = vst.msk [vmem:[#allocation3 + $0x18] sm:$0xff] %vm453_vm0, %v638_v29  ;;  %2354 = vmatprep.subr.msk.bf16.mxu1 %vm453_vm0, %v680_v30  ;;  %v739_v33 = vsel %vm453_vm0, %v680_v30, 0 }
 0x175   : > { %v648_v31 = vpop.permute.xlu1 %647  ;;  %v681_v32 = vld [vmem:[#allocation3 + $0x10] sm:$0xff] }
 0x176   : > { %659 = vst.msk [vmem:[#allocation4] sm:$0xff] %vm453_vm0, %v648_v31  ;;  %v742_v36 = vsel %vm453_vm0, %v681_v32, 0 }
 0x177   : > { %2228 = vmatpush3.bf16.xpose.msra.mxu1 %v739_v33 }
 0x178   : > { %2355 = vmatprep.subr.msk.bf16.mxu1 %vm453_vm0, %v681_v32 }
 0x179   : > { %v650_v34 = vpop.permute.xlu1 %649  ;;  %v682_v37 = vld [vmem:[#allocation3 + $0x18] sm:$0xff] }
 0x17a   : > { %660 = vst.msk [vmem:[#allocation4 + $0x8] sm:$0xff] %vm453_vm0, %v650_v34  ;;  %v745_v39 = vsel %vm453_vm0, %v682_v37, 0 }
 0x17d   : > { %v683_v35 = vld [vmem:[#allocation4] sm:$0xff] }
 0x17e   : > { %2265 = vmatprep.subr.bf16.mxu0 %v683_v35 }
 0x17f   : > { %2230 = vmatpush3.bf16.xpose.msra.mxu1 %v742_v36  ;;  %2266 = vmatpush3.bf16.msra.mxu0 %v683_v35 }
 0x180   : > { %2356 = vmatprep.subr.msk.bf16.mxu1 %vm453_vm0, %v682_v37 }
 0x181   : > { %v684_v38 = vld [vmem:[#allocation4 + $0x8] sm:$0xff] }
 0x182   : > { %2267 = vmatprep.subr.bf16.mxu0 %v684_v38 }
 0x183   : > { %2268 = vmatpush3.bf16.msra.mxu0 %v684_v38 }
 0x187   : > { %2232 = vmatpush3.bf16.xpose.msra.mxu1 %v745_v39 }
 0x18e   : > { %2234 = vmatmul.mubr.msk.bf16.vlgmr.msra.gmra.mrb[8].mxu1 %vm453_vm0, %v664_v40 }
 0x18f   : > { %2237 = vmatprep.mubr.msk.bf16.mxu1 %vm453_vm0, %v665_v41 }
 0x196   : > { %2238 = vmatmul.mubr.msk.bf16.gmra.mrb[12].mxu1 %vm453_vm0, %v666_v42 }
 0x197   : > { %2241 = vmatprep.mubr.msk.bf16.mxu1 %vm453_vm0, %v667_v43 }
 0x19e   : > { %2242 = vmatmul.mubr.msk.bf16.gmra.mrb[16].mxu1 %vm453_vm0, %v668_v44 }
 0x19f   : > { %2245 = vmatprep.mubr.msk.bf16.mxu1 %vm453_vm0, %v669_v45 }
 0x1a6   : > { %2246 = vmatmul.mubr.msk.bf16.gmra.mrb[20].mxu1 %vm453_vm0, %v670_v46 }
 0x1a7   : > { %2249 = vmatprep.mubr.msk.bf16.mxu1 %vm453_vm0, %v671_v47 }
 0x1ae   : > { %2250 = vmatmul.mubr.msk.bf16.gmra.mrb[24].mxu1 %vm453_vm0, %v672_v48 }
 0x1af   : > { %2253 = vmatprep.mubr.msk.bf16.mxu1 %vm453_vm0, %v673_v49 }
 0x1b6   : > { %2254 = vmatmul.mubr.msk.bf16.gmra.mrb[28].mxu1 %vm453_vm0, %v674_v50 }
 0x1b7   : > { %2257 = vmatprep.mubr.msk.bf16.mxu1 %vm453_vm0, %v675_v51 }
 0x1be   : > { %2258 = vmatmul.mubr.msk.bf16.gmra.mrb[32].mxu1 %vm453_vm0, %v676_v52 }
 0x1bf   : > { %2261 = vmatprep.mubr.msk.bf16.mxu1 %vm453_vm0, %v677_v53 }
 0x1c6   : > { %2262 = vmatmul.mubr.msk.bf16.gmra.mrb[36].mxu1 %vm453_vm0, %v678_v54 }
 0x261   : > { %v2745_v55 = vpop.f32.mrb[8].mxu1 }
 0x262   : > { %v2747_v56 = vpop.f32.mrb[9].mxu1  ;;  %v915_v57 = vsel %vm908_vm1, %v2745_v55, -inf }
 0x263   : > { %916 = vmax.xlane.f32.xlu0 %v915_v57  ;;  %v2751_v58 = vpop.f32.mrb[10].mxu1  ;;  %v909_v61 = vsel %vm908_vm1, %v2747_v56, -inf }
 0x264   : > { %v2753_v59 = vpop.f32.mrb[11].mxu1  ;;  %v918_v0 = vsel %vm908_vm1, %v2751_v58, -inf }
 0x265   : > { %v912_v60 = vsel %vm908_vm1, %v2753_v59, -inf }
 0x266   : > { %913 = vmax.xlane.f32.xlu1 %v912_v60 }
 0x267   : > { %910 = vmax.xlane.f32.xlu0 %v909_v61 }
 0x269   : > { %v2759_v62 = vpop.f32.mrb[12].mxu1 }
 0x26a   : > { %v2761_v63 = vpop.f32.mrb[13].mxu1  ;;  %v927_v1 = vsel %vm908_vm1, %v2759_v62, -inf }
 0x26b   : > { %919 = vmax.xlane.f32.xlu0 %v918_v0  ;;  %928 = vmax.xlane.f32.xlu1 %v927_v1  ;;  %v2767_v2 = vpop.f32.mrb[14].mxu1  ;;  %v921_v4 = vsel %vm908_vm1, %v2761_v63, -inf }
 0x26c   : > { %v2769_v3 = vpop.f32.mrb[15].mxu1  ;;  %v930_v5 = vsel %vm908_vm1, %v2767_v2, -inf }
 0x26d   : > { %v924_v8 = vsel %vm908_vm1, %v2769_v3, -inf }
 0x26f   : > { %922 = vmax.xlane.f32.xlu1 %v921_v4  ;;  %931 = vmax.xlane.f32.xlu0 %v930_v5 }
 0x271   : > { %v2775_v6 = vpop.f32.mrb[16].mxu1 }
 0x272   : > { %v2777_v7 = vpop.f32.mrb[17].mxu1  ;;  %v939_v9 = vsel %vm908_vm1, %v2775_v6, -inf }
 0x273   : > { %925 = vmax.xlane.f32.xlu0 %v924_v8  ;;  %940 = vmax.xlane.f32.xlu1 %v939_v9  ;;  %v2783_v10 = vpop.f32.mrb[18].mxu1  ;;  %v933_v12 = vsel %vm908_vm1, %v2777_v7, -inf }
 0x274   : > { %v2785_v11 = vpop.f32.mrb[19].mxu1  ;;  %v942_v13 = vsel %vm908_vm1, %v2783_v10, -inf }
 0x275   : > { %v936_v16 = vsel %vm908_vm1, %v2785_v11, -inf }
 0x277   : > { %934 = vmax.xlane.f32.xlu1 %v933_v12  ;;  %943 = vmax.xlane.f32.xlu0 %v942_v13 }
 0x279   : > { %v2791_v14 = vpop.f32.mrb[20].mxu1 }
 0x27a   : > { %v2793_v15 = vpop.f32.mrb[21].mxu1  ;;  %v951_v19 = vsel %vm908_vm1, %v2791_v14, -inf }
 0x27b   : > { %937 = vmax.xlane.f32.xlu0 %v936_v16  ;;  %952 = vmax.xlane.f32.xlu1 %v951_v19  ;;  %v2799_v22 = vpop.f32.mrb[22].mxu1  ;;  %v945_v24 = vsel %vm908_vm1, %v2793_v15, -inf }
 0x27c   : > { %v2801_v23 = vpop.f32.mrb[23].mxu1  ;;  %v954_v18 = vsel %vm908_vm1, %v2799_v22, -inf }
 0x27d   : > { %v948_v26 = vsel %vm908_vm1, %v2801_v23, -inf }
 0x27f   : > { %946 = vmax.xlane.f32.xlu1 %v945_v24  ;;  %955 = vmax.xlane.f32.xlu0 %v954_v18 }
 0x281   : > { %v2807_v21 = vpop.f32.mrb[24].mxu1 }
 0x282   : > { %v2809_v25 = vpop.f32.mrb[25].mxu1  ;;  %v963_v27 = vsel %vm908_vm1, %v2807_v21, -inf }
 0x283   : > { %949 = vmax.xlane.f32.xlu0 %v948_v26  ;;  %964 = vmax.xlane.f32.xlu1 %v963_v27  ;;  %v2815_v28 = vpop.f32.mrb[26].mxu1  ;;  %v957_v30 = vsel %vm908_vm1, %v2809_v25, -inf }
 0x284   : > { %v2817_v29 = vpop.f32.mrb[27].mxu1  ;;  %v966_v31 = vsel %vm908_vm1, %v2815_v28, -inf }
 0x285   : > { %v960_v34 = vsel %vm908_vm1, %v2817_v29, -inf }
 0x287   : > { %958 = vmax.xlane.f32.xlu1 %v957_v30  ;;  %967 = vmax.xlane.f32.xlu0 %v966_v31 }
 0x289   : > { %v2823_v32 = vpop.f32.mrb[28].mxu1 }
 0x28a   : > { %v2825_v33 = vpop.f32.mrb[29].mxu1  ;;  %v975_v35 = vsel %vm908_vm1, %v2823_v32, -inf }
 0x28b   : > { %961 = vmax.xlane.f32.xlu0 %v960_v34  ;;  %976 = vmax.xlane.f32.xlu1 %v975_v35  ;;  %v2831_v36 = vpop.f32.mrb[30].mxu1  ;;  %v969_v38 = vsel %vm908_vm1, %v2825_v33, -inf }
 0x28c   : > { %v2833_v37 = vpop.f32.mrb[31].mxu1  ;;  %v978_v39 = vsel %vm908_vm1, %v2831_v36, -inf }
 0x28d   : > { %v972_v42 = vsel %vm908_vm1, %v2833_v37, -inf }
 0x28f   : > { %970 = vmax.xlane.f32.xlu1 %v969_v38  ;;  %979 = vmax.xlane.f32.xlu0 %v978_v39 }
 0x291   : > { %v2839_v40 = vpop.f32.mrb[32].mxu1 }
 0x292   : > { %v2841_v41 = vpop.f32.mrb[33].mxu1  ;;  %v987_v43 = vsel %vm908_vm1, %v2839_v40, -inf }
 0x293   : > { %973 = vmax.xlane.f32.xlu0 %v972_v42  ;;  %988 = vmax.xlane.f32.xlu1 %v987_v43  ;;  %v2847_v44 = vpop.f32.mrb[34].mxu1  ;;  %v981_v46 = vsel %vm908_vm1, %v2841_v41, -inf }
 0x294   : > { %v2849_v45 = vpop.f32.mrb[35].mxu1  ;;  %v990_v47 = vsel %vm908_vm1, %v2847_v44, -inf }
 0x295   : > { %v984_v50 = vsel %vm908_vm1, %v2849_v45, -inf }
 0x297   : > { %982 = vmax.xlane.f32.xlu1 %v981_v46  ;;  %991 = vmax.xlane.f32.xlu0 %v990_v47 }
 0x299   : > { %v2855_v48 = vpop.f32.mrb[36].mxu1 }
 0x29a   : > { %v2857_v49 = vpop.f32.mrb[37].mxu1  ;;  %v999_v51 = vsel %vm908_vm1, %v2855_v48, -inf }
 0x29b   : > { %985 = vmax.xlane.f32.xlu0 %v984_v50  ;;  %1000 = vmax.xlane.f32.xlu1 %v999_v51  ;;  %v2863_v52 = vpop.f32.mrb[38].mxu1  ;;  %v993_v54 = vsel %vm908_vm1, %v2857_v49, -inf }
 0x29c   : > { %v2865_v53 = vpop.f32.mrb[39].mxu1  ;;  %v1002_v57 = vsel %vm908_vm1, %v2863_v52, -inf }
 0x29d   : > { %v996_v60 = vsel %vm908_vm1, %v2865_v53, -inf }
 0x29f   : > { %994 = vmax.xlane.f32.xlu1 %v993_v54  ;;  %1003 = vmax.xlane.f32.xlu0 %v1002_v57 }
 0x2a3   : > { %997 = vmax.xlane.f32.xlu0 %v996_v60 }
 0x2b9   : > { %651 = vrot.lane.b32.xlu0 %v2701_v17, %s2530_s27 }
 0x2f0   : > { %v917_v61 = vpop.xlane.xlu0 %916 }
 0x2f1   : > { %v1007_v0 = vsub.f32 %v2745_v55, %v917_v61 }
 0x2f3   : > { %v1041_v1 = vmul.f32 1.442695, %v1007_v0  ;;  %v914_v4 = vpop.xlane.xlu1 %913 }
 0x2f4   : > { %v911_v5 = vpop.xlane.xlu0 %910  ;;  %v1006_v9 = vsub.f32 %v2753_v59, %v914_v4 }
 0x2f5   : > { %2381 = vpow2.f32 %v1041_v1  ;;  %v1005_v8 = vsub.f32 %v2747_v56, %v911_v5 }
 0x2f6   : > { %v1039_v24 = vmul.f32 1.442695, %v1006_v9 }
 0x2f7   : > { %v1037_v12 = vmul.f32 1.442695, %v1005_v8 }
 0x2f8   : > { %v920_v13 = vpop.xlane.xlu0 %919  ;;  %v929_v16 = vpop.xlane.xlu1 %928 }
 0x2f9   : > { %2383 = vpow2.f32 %v1037_v12  ;;  %v1008_v19 = vsub.f32 %v2751_v58, %v920_v13  ;;  %v1011_v17 = vsub.f32 %v2759_v62, %v929_v16 }
 0x2fb   : > { %v1043_v18 = vmul.f32 1.442695, %v1008_v19  ;;  %v1049_v30 = vmul.f32 1.442695, %v1011_v17 }
 0x2fc   : > { %v923_v26 = vpop.xlane.xlu1 %922  ;;  %v932_v55 = vpop.xlane.xlu0 %931 }
 0x2fd   : > { %2385 = vpow2.f32 %v1043_v18  ;;  %v1009_v56 = vsub.f32 %v2761_v63, %v923_v26  ;;  %v1012_v38 = vsub.f32 %v2767_v2, %v932_v55 }
 0x2fe   : > { %2387 = vpow2.f32 %v1039_v24 }
 0x2ff   : > { %v2880_v27 = vpop.eup %2381  ;;  %2389 = vpow2.f32 %v1049_v30  ;;  %v1045_v62 = vmul.f32 1.442695, %v1009_v56  ;;  %v1051_v50 = vmul.f32 1.442695, %v1012_v38 }
 0x300   : > { %v926_v59 = vpop.xlane.xlu0 %925  ;;  %v941_v31 = vpop.xlane.xlu1 %940  ;;  %v1107_v34 = vsel %vm908_vm1, %v2880_v27, 0.0 }
 0x301   : > { %v1015_v58 = vsub.f32 %v2775_v6, %v941_v31  ;;  %1108 = vadd.xlane.f32.xlu1 %v1107_v34  ;;  %v1010_v51 = vsub.f32 %v2769_v3, %v926_v59 }
 0x303   : > { %v2886_v35 = vpop.eup %2383  ;;  %v1057_v39 = vmul.f32 1.442695, %v1015_v58 }
 0x304   : > { %v935_v42 = vpop.xlane.xlu1 %934  ;;  %v944_v43 = vpop.xlane.xlu0 %943  ;;  %v1101_v63 = vsel %vm908_vm1, %v2886_v35, 0.0 }
 0x305   : > { %v1013_v46 = vsub.f32 %v2777_v7, %v935_v42  ;;  %v1016_v47 = vsub.f32 %v2783_v10, %v944_v43  ;;  %1102 = vadd.xlane.f32.xlu1 %v1101_v63  ;;  %2391 = vpow2.f32 %v1057_v39  ;;  %v1047_v10 = vmul.f32 1.442695, %v1010_v51 }
 0x306   : > { %2393 = vpow2.f32 %v1045_v62 }
 0x307   : > { %v2893_v6 = vpop.eup %2385  ;;  %v1053_v54 = vmul.f32 1.442695, %v1013_v46  ;;  %v1059_v2 = vmul.f32 1.442695, %v1016_v47 }
 0x308   : > { %v938_v57 = vpop.xlane.xlu0 %937  ;;  %v1110_v60 = vsel %vm908_vm1, %v2893_v6, 0.0  ;;  %v2898_v61 = vpop.eup %2387 }
 0x309   : > { %2395 = vpow2.f32 %v1053_v54  ;;  %1111 = vadd.xlane.f32.xlu0 %v1110_v60  ;;  %v953_v7 = vpop.xlane.xlu1 %952  ;;  %v1014_v0 = vsub.f32 %v2785_v11, %v938_v57  ;;  %v1104_v3 = vsel %vm908_vm1, %v2898_v61, 0.0  ;;  %v2905_v4 = vpop.eup %2389 }
 0x30a   : > { %2397 = vpow2.f32 %v1051_v50  ;;  %v1019_v8 = vsub.f32 %v2791_v14, %v953_v7  ;;  %v1119_v11 = vsel %vm908_vm1, %v2905_v4, 0.0 }
 0x30b   : > { %2399 = vpow2.f32 %v1059_v2  ;;  %v1055_v5 = vmul.f32 1.442695, %v1014_v0 }
 0x30c   : > { %v2901_v1 = vpop.xlane.xlu0 %955  ;;  %2401 = vpow2.f32 %v1047_v10  ;;  %v1065_v18 = vmul.f32 1.442695, %v1019_v8 }
 0x30d   : > { %1105 = vadd.xlane.f32.xlu0 %v1104_v3  ;;  %v947_v12 = vpop.xlane.xlu1 %946  ;;  %2403 = vpow2.f32 %v1055_v5 }
 0x30e   : > { %v1017_v14 = vsub.f32 %v2793_v15, %v947_v12  ;;  %2405 = vpow2.f32 %v1065_v18 }
 0x30f   : > { %v2908_v9 = vpop.eup %2391 }
 0x310   : > { %v950_v13 = vpop.xlane.xlu0 %949  ;;  %v2912_v16 = vpop.eup %2393  ;;  %v1131_v19 = vsel %vm908_vm1, %v2908_v9, 0.0  ;;  %v1061_v31 = vmul.f32 1.442695, %v1017_v14 }
 0x311   : > { %1120 = vadd.xlane.f32.xlu0 %v1119_v11  ;;  %1132 = vadd.xlane.f32.xlu1 %v1131_v19  ;;  %v1113_v55 = vsel %vm908_vm1, %v2912_v16, 0.0  ;;  %v965_v59 = vpop.xlane.xlu1 %964  ;;  %v1018_v34 = vsub.f32 %v2801_v23, %v950_v13 }
 0x312   : > { %2407 = vpow2.f32 %v1061_v31  ;;  %v1023_v42 = vsub.f32 %v2807_v21, %v965_v59 }
 0x313   : > { %v2916_v24 = vpop.eup %2395  ;;  %v1063_v39 = vmul.f32 1.442695, %v1018_v34 }
 0x314   : > { %v968_v17 = vpop.xlane.xlu0 %967  ;;  %v1125_v26 = vsel %vm908_vm1, %v2916_v24, 0.0  ;;  %v2923_v30 = vpop.eup %2397  ;;  %v1073_v47 = vmul.f32 1.442695, %v1023_v42 }
 0x315   : > { %1114 = vadd.xlane.f32.xlu0 %v1113_v55  ;;  %v2925_v56 = vpop.eup %2399  ;;  %1126 = vadd.xlane.f32.xlu1 %v1125_v26  ;;  %v1122_v15 = vsel %vm908_vm1, %v2923_v30, 0.0  ;;  %v959_v43 = vpop.xlane.xlu1 %958  ;;  %2409 = vpow2.f32 %v1063_v39  ;;  %v1024_v60 = vsub.f32 %v2815_v28, %v968_v17 }
 0x316   : > { %v2930_v62 = vpop.eup %2401  ;;  %v1134_v38 = vsel %vm908_vm1, %v2925_v56, 0.0  ;;  %v1021_v50 = vsub.f32 %v2809_v25, %v959_v43  ;;  %2411 = vpow2.f32 %v1073_v47 }
 0x317   : > { %v1116_v23 = vsel %vm908_vm1, %v2930_v62, 0.0  ;;  %v2937_v46 = vpop.eup %2403  ;;  %v1075_v25 = vmul.f32 1.442695, %v1024_v60 }
 0x318   : > { %v962_v58 = vpop.xlane.xlu0 %961  ;;  %v1128_v54 = vsel %vm908_vm1, %v2937_v46, 0.0  ;;  %v2942_v2 = vpop.eup %2405  ;;  %v1069_v57 = vmul.f32 1.442695, %v1021_v50 }
 0x319   : > { %1123 = vadd.xlane.f32.xlu0 %v1122_v15  ;;  %1135 = vadd.xlane.f32.xlu1 %v1134_v38  ;;  %v977_v21 = vpop.xlane.xlu1 %976  ;;  %v1143_v10 = vsel %vm908_vm1, %v2942_v2, 0.0  ;;  %v1022_v3 = vsub.f32 %v2817_v29, %v962_v58 }
 0x31a   : > { %2413 = vpow2.f32 %v1069_v57  ;;  %v1027_v11 = vsub.f32 %v2823_v32, %v977_v21 }
 0x31b   : > { %2415 = vpow2.f32 %v1075_v25  ;;  %v1071_v28 = vmul.f32 1.442695, %v1022_v3 }
 0x31c   : > { %v980_v63 = vpop.xlane.xlu0 %979  ;;  %v2949_v0 = vpop.eup %2407  ;;  %v1081_v17 = vmul.f32 1.442695, %v1027_v11 }
 0x31d   : > { %1117 = vadd.xlane.f32.xlu0 %v1116_v23  ;;  %v971_v5 = vpop.xlane.xlu1 %970  ;;  %v1137_v12 = vsel %vm908_vm1, %v2949_v0, 0.0  ;;  %2417 = vpow2.f32 %v1071_v28 }
 0x31e   : > { %v1025_v26 = vsub.f32 %v2825_v33, %v971_v5  ;;  %2419 = vpow2.f32 %v1081_v17  ;;  %v1028_v33 = vsub.f32 %v2831_v36, %v980_v63 }
 0x31f   : > { %v2954_v13 = vpop.eup %2409 }
 0x320   : > { %v974_v51 = vpop.xlane.xlu0 %973  ;;  %v1140_v29 = vsel %vm908_vm1, %v2954_v13, 0.0  ;;  %v2963_v18 = vpop.eup %2411  ;;  %v1083_v47 = vmul.f32 1.442695, %v1028_v33 }
 0x321   : > { %1129 = vadd.xlane.f32.xlu0 %v1128_v54  ;;  %v989_v14 = vpop.xlane.xlu1 %988  ;;  %v1155_v32 = vsel %vm908_vm1, %v2963_v18, 0.0  ;;  %v1026_v31 = vsub.f32 %v2833_v37, %v974_v51  ;;  %v1020_v37 = vsub.f32 %v2799_v22, %v2901_v1 }
 0x322   : > { %v1031_v22 = vsub.f32 %v2839_v40, %v989_v14 }
 0x323   : > { %v1079_v39 = vmul.f32 1.442695, %v1026_v31  ;;  %v1067_v63 = vmul.f32 1.442695, %v1020_v37 }
 0x324   : > { %v2945_v7 = vpop.xlane.xlu0 %991  ;;  %v2968_v59 = vpop.eup %2413 }
 0x325   : > { %1144 = vadd.xlane.f32.xlu0 %v1143_v10  ;;  %v983_v34 = vpop.xlane.xlu1 %982  ;;  %v1149_v15 = vsel %vm908_vm1, %v2968_v59, 0.0  ;;  %v2973_v38 = vpop.eup %2415  ;;  %v1032_v10 = vsub.f32 %v2847_v44, %v2945_v7 }
 0x326   : > { %v1158_v42 = vsel %vm908_vm1, %v2973_v38, 0.0  ;;  %v1029_v50 = vsub.f32 %v2841_v41, %v983_v34 }
 0x327   : > { %v2979_v43 = vpop.eup %2417 }
 0x328   : > { %v986_v8 = vpop.xlane.xlu0 %985  ;;  %v1152_v51 = vsel %vm908_vm1, %v2979_v43, 0.0  ;;  %v2986_v36 = vpop.eup %2419  ;;  %v1085_v1 = vmul.f32 1.442695, %v1029_v50 }
 0x329   : > { %1138 = vadd.xlane.f32.xlu0 %v1137_v12  ;;  %v1001_v23 = vpop.xlane.xlu1 %1000  ;;  %v1030_v21 = vsub.f32 %v2849_v45, %v986_v8  ;;  %v1167_v41 = vsel %vm908_vm1, %v2986_v36, 0.0  ;;  %v1089_v45 = vmul.f32 1.442695, %v1031_v22  ;;  %v1091_v8 = vmul.f32 1.442695, %v1032_v10 }
 0x32a   : > { %653 = vrot.lane.b32.xlu1 %v2703_v20, %s2530_s27  ;;  %v1077_v20 = vmul.f32 1.442695, %v1025_v26  ;;  %v1035_v28 = vsub.f32 %v2855_v48, %v1001_v23 }
 0x32b   : > { %v1087_v25 = vmul.f32 1.442695, %v1030_v21 }
 0x32c   : > { %v2959_v19 = vpop.xlane.xlu0 %1003  ;;  %2421 = vpow2.f32 %v1077_v20  ;;  %v1097_v17 = vmul.f32 1.442695, %v1035_v28 }
 0x32d   : > { %1141 = vadd.xlane.f32.xlu0 %v1140_v29  ;;  %2423 = vpow2.f32 %v1079_v39  ;;  %v995_v57 = vpop.xlane.xlu1 %994 }
 0x32e   : > { %2425 = vpow2.f32 %v1083_v47  ;;  %v1033_v3 = vsub.f32 %v2857_v49, %v995_v57  ;;  %v1036_v49 = vsub.f32 %v2863_v52, %v2959_v19 }
 0x32f   : > { %2427 = vpow2.f32 %v1067_v63 }
 0x330   : > { %v998_v55 = vpop.xlane.xlu0 %997  ;;  %2429 = vpow2.f32 %v1085_v1  ;;  %v1093_v44 = vmul.f32 1.442695, %v1033_v3  ;;  %v1099_v26 = vmul.f32 1.442695, %v1036_v49 }
 0x331   : > { %1156 = vadd.xlane.f32.xlu0 %v1155_v32  ;;  %2431 = vpow2.f32 %v1087_v25  ;;  %v1034_v12 = vsub.f32 %v2865_v53, %v998_v55 }
 0x332   : > { %2433 = vpow2.f32 %v1089_v45 }
 0x333   : > { %2435 = vpow2.f32 %v1091_v8  ;;  %v1095_v29 = vmul.f32 1.442695, %v1034_v12 }
 0x334   : > { %v652_v58 = vpop.permute.xlu0 %651  ;;  %2437 = vpow2.f32 %v1093_v44 }
 0x335   : > { %661 = vst.msk [vmem:[#allocation4 + $0x10] sm:$0xff] %vm453_vm0, %v652_v58  ;;  %1150 = vadd.xlane.f32.xlu0 %v1149_v15  ;;  %2439 = vpow2.f32 %v1095_v29 }
 0x336   : > { %v2992_v60 = vpop.eup %2421  ;;  %2441 = vpow2.f32 %v1097_v17 }
 0x337   : > { %v1161_v40 = vsel %vm908_vm1, %v2992_v60, 0.0  ;;  %v2999_v5 = vpop.eup %2423  ;;  %2443 = vpow2.f32 %v1099_v26 }
 0x338   : > { %v1164_v7 = vsel %vm908_vm1, %v2999_v5, 0.0  ;;  %v3005_v11 = vpop.eup %2425 }
 0x339   : > { %1159 = vadd.xlane.f32.xlu0 %v1158_v42  ;;  %v3009_v14 = vpop.eup %2427  ;;  %v1170_v53 = vsel %vm908_vm1, %v3005_v11, 0.0 }
 0x33a   : > { %v3013_v48 = vpop.eup %2429  ;;  %v1146_v55 = vsel %vm908_vm1, %v3009_v14, 0.0 }
 0x33b   : > { %v3017_v32 = vpop.eup %2431  ;;  %v1173_v52 = vsel %vm908_vm1, %v3013_v48, 0.0 }
 0x33c   : > { %v685_v54 = vld [vmem:[#allocation4 + $0x10] sm:$0xff]  ;;  %v3021_v19 = vpop.eup %2433  ;;  %v1176_v20 = vsel %vm908_vm1, %v3017_v32, 0.0 }
 0x33d   : > { %1153 = vadd.xlane.f32.xlu0 %v1152_v51  ;;  %2269 = vmatprep.subr.bf16.mxu0 %v685_v54  ;;  %v3025_v31 = vpop.eup %2435  ;;  %v1179_v34 = vsel %vm908_vm1, %v3021_v19, 0.0 }
 0x33e   : > { %2270 = vmatpush3.bf16.msra.mxu0 %v685_v54  ;;  %v3029_v58 = vpop.eup %2437  ;;  %v1182_v15 = vsel %vm908_vm1, %v3025_v31, 0.0 }
 0x33f   : > { %v3033_v33 = vpop.eup %2439  ;;  %v1185_v39 = vsel %vm908_vm1, %v3029_v58, 0.0 }
 0x340   : > { %v3037_v42 = vpop.eup %2441  ;;  %v1188_v37 = vsel %vm908_vm1, %v3033_v33, 0.0 }
 0x341   : > { %1168 = vadd.xlane.f32.xlu0 %v1167_v41  ;;  %v3041_v23 = vpop.eup %2443  ;;  %v1191_v47 = vsel %vm908_vm1, %v3037_v42, 0.0 }
 0x342   : > { %v1194_v50 = vsel %vm908_vm1, %v3041_v23, 0.0 }
 0x345   : > { %1162 = vadd.xlane.f32.xlu0 %v1161_v40 }
 0x349   : > { %1165 = vadd.xlane.f32.xlu0 %v1164_v7 }
 0x34d   : > { %1171 = vadd.xlane.f32.xlu0 %v1170_v53 }
 0x34e   : > { %1147 = vadd.xlane.f32.xlu1 %v1146_v55 }
 0x351   : > { %1174 = vadd.xlane.f32.xlu0 %v1173_v52 }
 0x352   : > { %1177 = vadd.xlane.f32.xlu1 %v1176_v20 }
 0x355   : > { %1180 = vadd.xlane.f32.xlu0 %v1179_v34 }
 0x356   : > { %1183 = vadd.xlane.f32.xlu1 %v1182_v15 }
 0x359   : > { %1186 = vadd.xlane.f32.xlu0 %v1185_v39 }
 0x35a   : > { %1189 = vadd.xlane.f32.xlu1 %v1188_v37 }
 0x35d   : > { %1192 = vadd.xlane.f32.xlu0 %v1191_v47 }
 0x35e   : > { %1195 = vadd.xlane.f32.xlu1 %v1194_v50 }
 0x38e   : > { %v1109_v51 = vpop.xlane.xlu1 %1108 }
 0x392   : > { %v1103_v54 = vpop.xlane.xlu1 %1102 }
 0x393   : > { %2445 = vrcp.f32 %v1103_v54 }
 0x396   : > { %v1112_v63 = vpop.xlane.xlu0 %1111 }
 0x39a   : > { %v1106_v21 = vpop.xlane.xlu0 %1105 }
 0x39b   : > { %2447 = vrcp.f32 %v1106_v21 }
 0x39c   : > { %2449 = vrcp.f32 %v1112_v63 }
 0x39d   : > { %v2446_v41 = vpop.eup %2445  ;;  %2451 = vrcp.f32 %v1109_v51 }
 0x39e   : > { %v1121_v22 = vpop.xlane.xlu0 %1120  ;;  %v1133_v1 = vpop.xlane.xlu1 %1132  ;;  %v1229_v3 = vmul.f32 %v2446_v41, %v2886_v35 }
 0x3a2   : > { %v1115_v57 = vpop.xlane.xlu0 %1114  ;;  %v1127_v10 = vpop.xlane.xlu1 %1126 }
 0x3a3   : > { %2453 = vrcp.f32 %v1115_v57 }
 0x3a5   : > { %v2448_v25 = vpop.eup %2447 }
 0x3a6   : > { %v1124_v45 = vpop.xlane.xlu0 %1123  ;;  %v1230_v40 = vmul.f32 %v2448_v25, %v2898_v61  ;;  %v1136_v8 = vpop.xlane.xlu1 %1135 }
 0x3a7   : > { %v2450_v49 = vpop.eup %2449 }
 0x3a8   : > { %v1261_v12 = vpack.c.bf16 %v1230_v40, %v1229_v3  ;;  %v2452_v35 = vpop.eup %2451  ;;  %v1232_v61 = vmul.f32 %v2450_v49, %v2893_v6 }
 0x3a9   : > { %v1231_v26 = vmul.f32 %v2452_v35, %v2880_v27 }
 0x3aa   : > { %2273 = vmatprep.mubr.msk.bf16.mxu0 %vm908_vm1, %v1261_v12  ;;  %v1118_v28 = vpop.xlane.xlu0 %1117  ;;  %v654_v44 = vpop.permute.xlu1 %653 }
 0x3ab   : > { %2455 = vrcp.f32 %v1118_v28  ;;  %662 = vst.msk [vmem:[#allocation4 + $0x18] sm:$0xff] %vm453_vm0, %v654_v44  ;;  %v1262_v20 = vpack.c.bf16 %v1232_v61, %v1231_v26 }
 0x3ac   : > { %2457 = vrcp.f32 %v1124_v45 }
 0x3ad   : > { %2459 = vrcp.f32 %v1121_v22  ;;  %v2454_v17 = vpop.eup %2453 }
 0x3ae   : > { %v1130_v7 = vpop.xlane.xlu0 %1129  ;;  %v1233_v34 = vmul.f32 %v2454_v17, %v2912_v16 }
 0x3af   : > { %2461 = vrcp.f32 %v1130_v7 }
 0x3b0   : > { %2463 = vrcp.f32 %v1127_v10 }
 0x3b1   : > { %2465 = vrcp.f32 %v1136_v8 }
 0x3b2   : > { %v1145_v29 = vpop.xlane.xlu0 %1144  ;;  %v686_v53 = vld [vmem:[#allocation4 + $0x18] sm:$0xff]  ;;  %2467 = vrcp.f32 %v1133_v1 }
 0x3b3   : > { %2271 = vmatprep.subr.bf16.mxu0 %v686_v53 }
 0x3b4   : > { %2272 = vmatpush3.bf16.msra.mxu0 %v686_v53 }
 0x3b5   : > { %v2456_v55 = vpop.eup %2455 }
 0x3b6   : > { %v1139_v52 = vpop.xlane.xlu0 %1138  ;;  %v1234_v15 = vmul.f32 %v2456_v55, %v2930_v62  ;;  %v2458_v39 = vpop.eup %2457 }
 0x3b7   : > { %v2460_v37 = vpop.eup %2459  ;;  %2274 = vmatmul.mubr.msk.bf16.vlgmr.msra.gmra.mrb[0].mxu0 %vm908_vm1, %v1262_v20  ;;  %2469 = vrcp.f32 %v1139_v52  ;;  %v1236_v51 = vmul.f32 %v2458_v39, %v2923_v30 }
 0x3b8   : > { %v1263_v6 = vpack.c.bf16 %v1234_v15, %v1233_v34  ;;  %v1235_v16 = vmul.f32 %v2460_v37, %v2905_v4 }
 0x3b9   : > { %v2462_v47 = vpop.eup %2461 }
 0x3ba   : > { %v2464_v50 = vpop.eup %2463  ;;  %2277 = vmatprep.mubr.msk.bf16.mxu0 %vm908_vm1, %v1263_v6  ;;  %v1142_v27 = vpop.xlane.xlu0 %1141  ;;  %v1238_v54 = vmul.f32 %v2462_v47, %v2937_v46  ;;  %v1264_v21 = vpack.c.bf16 %v1236_v51, %v1235_v16 }
 0x3bb   : > { %2471 = vrcp.f32 %v1142_v27  ;;  %v1237_v62 = vmul.f32 %v2464_v50, %v2916_v24  ;;  %v2466_v22 = vpop.eup %2465 }
 0x3bc   : > { %v2468_v57 = vpop.eup %2467  ;;  %v1240_v10 = vmul.f32 %v2466_v22, %v2925_v56 }
 0x3bd   : > { %v1265_v1 = vpack.c.bf16 %v1238_v54, %v1237_v62  ;;  %v1239_v25 = vmul.f32 %v2468_v57, %v2908_v9 }
 0x3be   : > { %v1157_v63 = vpop.xlane.xlu0 %1156 }
 0x3bf   : > { %2278 = vmatmul.mubr.msk.bf16.gmra.mrb[4].mxu0 %vm908_vm1, %v1264_v21  ;;  %v1266_v4 = vpack.c.bf16 %v1240_v10, %v1239_v25 }
 0x3c0   : > { %2281 = vmatprep.mubr.msk.bf16.mxu0 %vm908_vm1, %v1265_v1 }
 0x3c1   : > { %v2470_v30 = vpop.eup %2469 }
 0x3c2   : > { %v1151_v41 = vpop.xlane.xlu0 %1150  ;;  %v1241_v24 = vmul.f32 %v2470_v30, %v2949_v0 }
 0x3c5   : > { %v2472_v46 = vpop.eup %2471 }
 0x3c6   : > { %v1160_v45 = vpop.xlane.xlu0 %1159  ;;  %v1242_v3 = vmul.f32 %v2472_v46, %v2954_v13 }
 0x3c7   : > { %2282 = vmatmul.mubr.msk.bf16.gmra.mrb[8].mxu0 %vm908_vm1, %v1266_v4 }
 0x3c8   : > { %v1267_v40 = vpack.c.bf16 %v1242_v3, %v1241_v24 }
 0x3ca   : > { %2285 = vmatprep.mubr.msk.bf16.mxu0 %vm908_vm1, %v1267_v40  ;;  %v1154_v8 = vpop.xlane.xlu0 %1153 }
 0x3cb   : > { %2473 = vrcp.f32 %v1154_v8 }
 0x3cc   : > { %2475 = vrcp.f32 %v1145_v29 }
 0x3cd   : > { %2477 = vrcp.f32 %v1151_v41 }
 0x3ce   : > { %v1169_v12 = vpop.xlane.xlu0 %1168 }
 0x3d2   : > { %v1163_v28 = vpop.xlane.xlu0 %1162 }
 0x3d5   : > { %v2474_v7 = vpop.eup %2473 }
 0x3d6   : > { %v1166_v44 = vpop.xlane.xlu0 %1165  ;;  %v2476_v49 = vpop.eup %2475  ;;  %v1246_v17 = vmul.f32 %v2474_v7, %v2979_v43 }
 0x3d7   : > { %v2478_v35 = vpop.eup %2477  ;;  %v1243_v29 = vmul.f32 %v2476_v49, %v2942_v2 }
 0x3d8   : > { %v1245_v52 = vmul.f32 %v2478_v35, %v2968_v59 }
 0x3da   : > { %v1172_v9 = vpop.xlane.xlu0 %1171  ;;  %v1269_v15 = vpack.c.bf16 %v1246_v17, %v1245_v52  ;;  %v2510_v17 = vld [vmem:[%s3316_s11 + $0x1] ss:$0 sm:$0xff] }
 0x3db   : > { %v1148_v56 = vpop.xlane.xlu1 %1147 }
 0x3dc   : > { %2479 = vrcp.f32 %v1148_v56 }
 0x3dd   : > { %2481 = vrcp.f32 %v1160_v45 }
 0x3de   : > { %2483 = vrcp.f32 %v1166_v44  ;;  %v1175_v0 = vpop.xlane.xlu0 %1174 }
 0x3df   : > { %2485 = vrcp.f32 %v1157_v63  ;;  %v1178_v13 = vpop.xlane.xlu1 %1177 }
 0x3e0   : > { %2487 = vrcp.f32 %v1163_v28 }
 0x3e1   : > { %2489 = vrcp.f32 %v1172_v9 }
 0x3e2   : > { %v1181_v53 = vpop.xlane.xlu0 %1180  ;;  %2491 = vrcp.f32 %v1175_v0 }
 0x3e3   : > { %v1184_v55 = vpop.xlane.xlu1 %1183  ;;  %2493 = vrcp.f32 %v1178_v13  ;;  %v2509_v13 = vld [vmem:[%s3316_s11] ss:$0 sm:$0xff] }
 0x3e4   : > { %2495 = vrcp.f32 %v1169_v12 }
 0x3e5   : > { %2497 = vrcp.f32 %v1181_v53 }
 0x3e6   : > { %v2480_v61 = vpop.eup %2479  ;;  %v1187_v6 = vpop.xlane.xlu0 %1186  ;;  %2499 = vrcp.f32 %v1184_v55 }
 0x3e7   : > { %v1244_v26 = vmul.f32 %v2480_v61, %v3009_v14  ;;  %v2482_v34 = vpop.eup %2481  ;;  %v1190_v14 = vpop.xlane.xlu1 %1189  ;;  %2501 = vrcp.f32 %v1187_v6 }
 0x3e8   : > { %v2484_v39 = vpop.eup %2483  ;;  %v1248_v2 = vmul.f32 %v2482_v34, %v2973_v38  ;;  %2503 = vrcp.f32 %v1190_v14 }
 0x3e9   : > { %v1268_v20 = vpack.c.bf16 %v1244_v26, %v1243_v29  ;;  %v2486_v37 = vpop.eup %2485  ;;  %v1250_v47 = vmul.f32 %v2484_v39, %v2999_v5 }
 0x3ea   : > { %v2488_v43 = vpop.eup %2487  ;;  %v1247_v59 = vmul.f32 %v2486_v37, %v2963_v18  ;;  %v1193_v38 = vpop.xlane.xlu0 %1192 }
 0x3eb   : > { %2286 = vmatmul.mubr.msk.bf16.gmra.mrb[12].mxu0 %vm908_vm1, %v1268_v20  ;;  %v1249_v50 = vmul.f32 %v2488_v43, %v2992_v60  ;;  %v2490_v27 = vpop.eup %2489  ;;  %v1196_v21 = vpop.xlane.xlu1 %1195  ;;  %2505 = vrcp.f32 %v1193_v38 }
 0x3ec   : > { %2289 = vmatprep.mubr.msk.bf16.mxu0 %vm908_vm1, %v1269_v15  ;;  %v1270_v51 = vpack.c.bf16 %v1248_v2, %v1247_v59  ;;  %v2492_v54 = vpop.eup %2491  ;;  %v1252_v5 = vmul.f32 %v2490_v27, %v3005_v11  ;;  %2507 = vrcp.f32 %v1196_v21 }
 0x3ed   : > { %v1271_v16 = vpack.c.bf16 %v1250_v47, %v1249_v50  ;;  %v2494_v62 = vpop.eup %2493  ;;  %v1253_v18 = vmul.f32 %v2492_v54, %v3013_v48 }
 0x3ee   : > { %v2496_v63 = vpop.eup %2495  ;;  %v1254_v22 = vmul.f32 %v2494_v62, %v3017_v32 }
 0x3ef   : > { %v1251_v60 = vmul.f32 %v2496_v63, %v2986_v36  ;;  %v2498_v1 = vpop.eup %2497 }
 0x3f0   : > { %v2500_v57 = vpop.eup %2499  ;;  %v1273_v30 = vpack.c.bf16 %v1254_v22, %v1253_v18  ;;  %v1255_v11 = vmul.f32 %v2498_v1, %v3021_v19  ;;  %v2369_v19 = vld [vmem:[%s3308_s3] sm:$0xff]  }
 0x3f1   : > { %v1272_v41 = vpack.c.bf16 %v1252_v5, %v1251_v60  ;;  %v2502_v10 = vpop.eup %2501  ;;  %v1256_v48 = vmul.f32 %v2500_v57, %v3025_v31  ;;  %2305 = vmatprep.subr.bf16.mxu0 %v2369_v19  ;;  %v2370_v31 = vld [vmem:[%s3308_s3 + $0x8] sm:$0xff]  }
 0x3f2   : > { %v2504_v25 = vpop.eup %2503  ;;  %v1257_v32 = vmul.f32 %v2502_v10, %v3029_v58  ;;  %2306 = vmatpush3.bf16.msra.mxu0 %v2369_v19  ;;  %v2371_v58 = vld [vmem:[%s3310_s5] sm:$0xff]  }
 0x3f3   : > { %2290 = vmatmul.mubr.msk.bf16.gmra.mrb[16].mxu0 %vm908_vm1, %v1270_v51  ;;  %v1258_v46 = vmul.f32 %v2504_v25, %v3033_v33  ;;  %v1274_v45 = vpack.c.bf16 %v1256_v48, %v1255_v11  ;;  %2307 = vmatprep.subr.bf16.mxu0 %v2370_v31  ;;  %v2372_v33 = vld [vmem:[%s3310_s5 + $0x8] sm:$0xff]  }
 0x3f4   : > { %2293 = vmatprep.mubr.msk.bf16.mxu0 %vm908_vm1, %v1271_v16  ;;  %2317 = vmatprep.subr.bf16.mxu1 %v2371_v58 }
 0x3f5   : > { %v2506_v36 = vpop.eup %2505  ;;  %v1275_v24 = vpack.c.bf16 %v1258_v46, %v1257_v32  ;;  %2318 = vmatpush3.bf16.msra.mxu1 %v2371_v58 }
 0x3f6   : > { %v2508_v4 = vpop.eup %2507  ;;  %v1259_v3 = vmul.f32 %v2506_v36, %v3037_v42  ;;  %2308 = vmatpush3.bf16.msra.mxu0 %v2370_v31  ;;  %2319 = vmatprep.subr.bf16.mxu1 %v2372_v33 }
 0x3f7   : > { %v1260_v40 = vmul.f32 %v2508_v4, %v3041_v23 }
 0x3f9   : > { %v1276_v8 = vpack.c.bf16 %v1260_v40, %v1259_v3  ;;  %2320 = vmatpush3.bf16.msra.mxu1 %v2372_v33 }
 0x3fb   : > { %2294 = vmatmul.mubr.msk.bf16.gmra.mrb[20].mxu0 %vm908_vm1, %v1272_v41 }
 0x3fc   : > { %2297 = vmatprep.mubr.msk.bf16.mxu0 %vm908_vm1, %v1273_v30 }
 0x403   : > { %2298 = vmatmul.mubr.msk.bf16.gmra.mrb[24].mxu0 %vm908_vm1, %v1274_v45 }
 0x404   : > { %2301 = vmatprep.mubr.msk.bf16.mxu0 %vm908_vm1, %v1275_v24 }
 0x40b   : > { %2302 = vmatmul.mubr.msk.bf16.gmra.mrb[28].mxu0 %vm908_vm1, %v1276_v8  ;;  %v2511_v8 = vld [vmem:[%s3316_s11 + $0x2] ss:$0 sm:$0xff] }
 0x48a   : > { %v2275_v42 = vpop.f32.mrb[0].mxu0 }
 0x48b   : > { %v1359_v23 = vpop.f32.mrb[1].mxu0  ;;  %v1488_v7 = vmul.f32 %v2509_v13, %v2275_v42 }
 0x48c   : > { %v2276_v12 = vpop.f32.mrb[2].mxu0  ;;  %v1486_v49 = vmul.f32 %v2509_v13, %v1359_v23 }
 0x48d   : > { %v1362_v28 = vpop.f32.mrb[3].mxu0  ;;  %v1489_v61 = vmul.f32 %v2509_v13, %v2276_v12  ;;  %v1532_v20 = vsel %vm453_vm0, %v1488_v7, 0.0 }
 0x48e   : > { %v1487_v26 = vmul.f32 %v2509_v13, %v1362_v28  ;;  %v1518_v37 = vsel %vm453_vm0, %v1486_v49, 0.0 }
 0x48f   : > { %v1539_v14 = vsel %vm453_vm0, %v1489_v61, 0.0 }
 0x490   : > { %v1525_v50 = vsel %vm453_vm0, %v1487_v26, 0.0 }
 0x492   : > { %v2279_v44 = vpop.f32.mrb[4].mxu0 }
 0x493   : > { %v1375_v9 = vpop.f32.mrb[5].mxu0  ;;  %v1492_v16 = vmul.f32 %v2509_v13, %v2279_v44 }
 0x494   : > { %v2280_v56 = vpop.f32.mrb[6].mxu0  ;;  %v1490_v62 = vmul.f32 %v2509_v13, %v1375_v9 }
 0x495   : > { %v1378_v0 = vpop.f32.mrb[7].mxu0  ;;  %v1493_v38 = vmul.f32 %v2509_v13, %v2280_v56  ;;  %v1560_v1 = vsel %vm453_vm0, %v1492_v16, 0.0 }
 0x496   : > { %v1491_v18 = vmul.f32 %v2509_v13, %v1378_v0  ;;  %v1546_v30 = vsel %vm453_vm0, %v1490_v62, 0.0 }
 0x497   : > { %v1567_v32 = vsel %vm453_vm0, %v1493_v38, 0.0 }
 0x498   : > { %v1553_v45 = vsel %vm453_vm0, %v1491_v18, 0.0 }
 0x49a   : > { %v2283_v35 = vpop.f32.mrb[8].mxu0 }
 0x49b   : > { %v1496_v53 = vmul.f32 %v2510_v17, %v2283_v35  ;;  %v1391_v29 = vpop.f32.mrb[9].mxu0 }
 0x49c   : > { %v1494_v55 = vmul.f32 %v2510_v17, %v1391_v29  ;;  %v2284_v52 = vpop.f32.mrb[10].mxu0 }
 0x49d   : > { %v1533_v34 = vsel %vm453_vm0, %v1496_v53, 0.0  ;;  %v1497_v15 = vmul.f32 %v2510_v17, %v2284_v52  ;;  %v1394_v39 = vpop.f32.mrb[11].mxu0 }
 0x49e   : > { %v1534_v43 = vadd.f32 %v1533_v34, %v1532_v20  ;;  %v1519_v6 = vsel %vm453_vm0, %v1494_v55, 0.0  ;;  %v1495_v2 = vmul.f32 %v2510_v17, %v1394_v39 }
 0x49f   : > { %v1520_v47 = vadd.f32 %v1519_v6, %v1518_v37  ;;  %v1540_v59 = vsel %vm453_vm0, %v1497_v15, 0.0 }
 0x4a0   : > { %v1541_v27 = vadd.f32 %v1540_v59, %v1539_v14  ;;  %v1526_v51 = vsel %vm453_vm0, %v1495_v2, 0.0 }
 0x4a1   : > { %v1527_v54 = vadd.f32 %v1526_v51, %v1525_v50 }
 0x4be   : > { %v2287_v63 = vpop.f32.mrb[12].mxu0 }
 0x4bf   : > { %v1500_v21 = vmul.f32 %v2510_v17, %v2287_v63  ;;  %v1407_v5 = vpop.f32.mrb[13].mxu0 }
 0x4c0   : > { %v1498_v22 = vmul.f32 %v2510_v17, %v1407_v5  ;;  %v2288_v60 = vpop.f32.mrb[14].mxu0 }
 0x4c1   : > { %v1561_v57 = vsel %vm453_vm0, %v1500_v21, 0.0  ;;  %v1501_v41 = vmul.f32 %v2510_v17, %v2288_v60  ;;  %v1410_v10 = vpop.f32.mrb[15].mxu0 }
 0x4c2   : > { %v1562_v25 = vadd.f32 %v1561_v57, %v1560_v1  ;;  %v1547_v11 = vsel %vm453_vm0, %v1498_v22, 0.0  ;;  %v1499_v48 = vmul.f32 %v2510_v17, %v1410_v10 }
 0x4c3   : > { %v1548_v46 = vadd.f32 %v1547_v11, %v1546_v30  ;;  %v1568_v36 = vsel %vm453_vm0, %v1501_v41, 0.0 }
 0x4c4   : > { %v1569_v4 = vadd.f32 %v1568_v36, %v1567_v32  ;;  %v1554_v24 = vsel %vm453_vm0, %v1499_v48, 0.0 }
 0x4c5   : > { %v1555_v3 = vadd.f32 %v1554_v24, %v1553_v45 }
 0x4c6   : > { %v2291_v40 = vpop.f32.mrb[16].mxu0 }
 0x4c7   : > { %v1504_v19 = vmul.f32 %v2511_v8, %v2291_v40  ;;  %v1423_v31 = vpop.f32.mrb[17].mxu0 }
 0x4c8   : > { %v1502_v58 = vmul.f32 %v2511_v8, %v1423_v31  ;;  %v2292_v33 = vpop.f32.mrb[18].mxu0 }
 0x4c9   : > { %v1535_v42 = vsel %vm453_vm0, %v1504_v19, 0.0  ;;  %v1505_v23 = vmul.f32 %v2511_v8, %v2292_v33  ;;  %v1426_v12 = vpop.f32.mrb[19].mxu0 }
 0x4ca   : > { %v1536_v28 = vadd.f32 %v1535_v42, %v1534_v43  ;;  %v1521_v44 = vsel %vm453_vm0, %v1502_v58, 0.0  ;;  %v1503_v9 = vmul.f32 %v2511_v8, %v1426_v12 }
 0x4cb   : > { %v1522_v56 = vadd.f32 %v1521_v44, %v1520_v47  ;;  %v1542_v0 = vsel %vm453_vm0, %v1505_v23, 0.0  ;;  %v2512_v47 = vld [vmem:[%s3316_s11 + $0x3] ss:$0 sm:$0xff] }
 0x4cc   : > { %v1543_v13 = vadd.f32 %v1542_v0, %v1541_v27  ;;  %v1528_v7 = vsel %vm453_vm0, %v1503_v9, 0.0  ;;  %v2373_v44 = vld [vmem:[%s3312_s7] sm:$0xff]   ;;  %v2374_v9 = vld [vmem:[%s3312_s7 + $0x8] sm:$0xff]   ;;  %v2376_v0 = vld [vmem:[%s3312_s7 + $0x18] sm:$0xff]  }
 0x4cd   : > { %v1529_v49 = vadd.f32 %v1528_v7, %v1527_v54  ;;  %2329 = vmatprep.subr.bf16.mxu0 %v2373_v44  ;;  %v2378_v7 = vld [vmem:[%s3312_s7 + $0x28] sm:$0xff]  }
 0x4ce   : > { %v2295_v35 = vpop.f32.mrb[20].mxu0 }
 0x4cf   : > { %v1508_v61 = vmul.f32 %v2511_v8, %v2295_v35  ;;  %v1439_v17 = vpop.f32.mrb[21].mxu0 }
 0x4d0   : > { %v1506_v53 = vmul.f32 %v2511_v8, %v1439_v17  ;;  %v2296_v29 = vpop.f32.mrb[22].mxu0 }
 0x4d1   : > { %v1563_v26 = vsel %vm453_vm0, %v1508_v61, 0.0  ;;  %v1509_v55 = vmul.f32 %v2511_v8, %v2296_v29  ;;  %v1442_v52 = vpop.f32.mrb[23].mxu0 }
 0x4d2   : > { %v1564_v20 = vadd.f32 %v1563_v26, %v1562_v25  ;;  %v1549_v34 = vsel %vm453_vm0, %v1506_v53, 0.0  ;;  %v1507_v15 = vmul.f32 %v2511_v8, %v1442_v52  ;;  %v2513_v26 = vld [vmem:[%s2618_s13 + $0x10] sm:$0xff]  ;;  %v3185_v52 = vld [vmem:[%s3314_s9] ss:$0 sm:$0xff] }
 0x4d3   : > { %v1550_v39 = vadd.f32 %v1549_v34, %v1548_v46  ;;  %v1570_v37 = vsel %vm453_vm0, %v1509_v55, 0.0 }
 0x4d4   : > { %v1571_v43 = vadd.f32 %v1570_v37, %v1569_v4  ;;  %v1556_v6 = vsel %vm453_vm0, %v1507_v15, 0.0  ;;  %v2514_v15 = vld [vmem:[%s2618_s13] sm:$0xff] }
 0x4d5   : > { %v1557_v2 = vadd.f32 %v1556_v6, %v1555_v3 }
 0x4d6   : > { %v2299_v14 = vpop.f32.mrb[24].mxu0 }
 0x4d7   : > { %v1512_v59 = vmul.f32 %v2512_v47, %v2299_v14  ;;  %v1455_v50 = vpop.f32.mrb[25].mxu0  ;;  %v2516_v14 = vld [vmem:[%s2618_s13 + $0x8] sm:$0xff] }
 0x4d8   : > { %v1510_v27 = vmul.f32 %v2512_v47, %v1455_v50  ;;  %v2300_v51 = vpop.f32.mrb[26].mxu0  ;;  %v3195_v50 = vld [vmem:[%s3315_s10] ss:$0 sm:$0xff] }
 0x4d9   : > { %v1537_v54 = vsel %vm453_vm0, %v1512_v59, 0.0  ;;  %v1513_v16 = vmul.f32 %v2512_v47, %v2300_v51  ;;  %v1458_v62 = vpop.f32.mrb[27].mxu0 }
 0x4da   : > { %v1538_v63 = vadd.f32 %v1537_v54, %v1536_v28  ;;  %v1523_v38 = vsel %vm453_vm0, %v1510_v27, 0.0  ;;  %v1511_v21 = vmul.f32 %v2512_v47, %v1458_v62 }
 0x4db   : > { %v1524_v5 = vadd.f32 %v1523_v38, %v1522_v56  ;;  %v1544_v18 = vsel %vm453_vm0, %v1513_v16, 0.0  ;;  %v2375_v56 = vld [vmem:[%s3312_s7 + $0x10] sm:$0xff]  }
 0x4dc   : > { %v1545_v22 = vadd.f32 %v1544_v18, %v1543_v13  ;;  %v1530_v60 = vsel %vm453_vm0, %v1511_v21, 0.0  ;;  %v2377_v13 = vld [vmem:[%s3312_s7 + $0x20] sm:$0xff]  }
 0x4dd   : > { %v1531_v1 = vadd.f32 %v1530_v60, %v1529_v49  ;;  %v2116_v49 = vld [vmem:[%s3309_s4] ss:$0 sm:$0xff]  ;;  %v2517_v60 = vld [vmem:[%s2618_s13 + $0x30] sm:$0xff] }
 0x4de   : > { %v1575_v57 = vpack.c.bf16 %v1545_v22, %v1538_v63  ;;  %v2303_v41 = vpop.f32.mrb[28].mxu0 }
 0x4df   : > { %v1574_v10 = vpack.c.bf16 %v1531_v1, %v1524_v5  ;;  %v1516_v30 = vmul.f32 %v2512_v47, %v2303_v41  ;;  %v1471_v25 = vpop.f32.mrb[29].mxu0 }
 0x4e0   : > { %1579 = vst.msk [vmem:[#allocation5 + $0x8] sm:$0xff] %vm453_vm0, %v1575_v57  ;;  %v1514_v11 = vmul.f32 %v2512_v47, %v1471_v25  ;;  %v2304_v48 = vpop.f32.mrb[30].mxu0 }
 0x4e1   : > { %1578 = vst.msk [vmem:[#allocation5] sm:$0xff] %vm453_vm0, %v1574_v10  ;;  %v1565_v32 = vsel %vm453_vm0, %v1516_v30, 0.0  ;;  %v1517_v46 = vmul.f32 %v2512_v47, %v2304_v48  ;;  %v1474_v36 = vpop.f32.mrb[31].mxu0  ;;  %v2518_v10 = vld [vmem:[%s2618_s13 + $0x20] sm:$0xff] }
 0x4e2   : > { %v1566_v45 = vadd.f32 %v1565_v32, %v1564_v20  ;;  %v1551_v4 = vsel %vm453_vm0, %v1514_v11, 0.0  ;;  %v1515_v24 = vmul.f32 %v2512_v47, %v1474_v36  ;;  %v2519_v32 = vld [vmem:[%s2618_s13 + $0x38] sm:$0xff] }
 0x4e3   : > { %v1552_v3 = vadd.f32 %v1551_v4, %v1550_v39  ;;  %v1572_v40 = vsel %vm453_vm0, %v1517_v46, 0.0 }
 0x4e4   : > { %v1573_v8 = vadd.f32 %v1572_v40, %v1571_v43  ;;  %v1558_v19 = vsel %vm453_vm0, %v1515_v24, 0.0  ;;  %v2515_v43 = vld [vmem:[%s2618_s13 + $0x18] sm:$0xff] }
 0x4e5   : > { %v1559_v31 = vadd.f32 %v1558_v19, %v1557_v2 }
 0x4e6   : > { %v1577_v58 = vpack.c.bf16 %v1573_v8, %v1566_v45  ;;  %v2520_v45 = vld [vmem:[%s2618_s13 + $0x28] sm:$0xff] }
 0x4e7   : > { %v1576_v33 = vpack.c.bf16 %v1559_v31, %v1552_v3  ;;  %v1583_v23 = vld [vmem:[#allocation5 + $0x8] sm:$0xff] }
 0x4e8   : > { %1581 = vst.msk [vmem:[#allocation5 + $0x18] sm:$0xff] %vm453_vm0, %v1577_v58  ;;  %v1582_v42 = vld [vmem:[#allocation5] sm:$0xff] }
 0x4e9   : > { %1580 = vst.msk [vmem:[#allocation5 + $0x10] sm:$0xff] %vm453_vm0, %v1576_v33  ;;  %2309 = vmatprep.mubr.msk.bf16.mxu0 %vm453_vm0, %v1582_v42 }
 0x4ea   : > { %2310 = vmatmul.mubr.msk.bf16.vlgmr.msra.gmra.mrb[32].mxu0 %vm453_vm0, %v1583_v23  ;;  %v2379_v23 = vld [vmem:[%s3312_s7 + $0x30] sm:$0xff]  }
 0x4eb   : > { %2330 = vmatpush3.bf16.msra.mxu0 %v2373_v44 }
 0x4ec   : > { %2331 = vmatprep.subr.bf16.mxu0 %v2374_v9 }
 0x4ef   : > { %v1585_v28 = vld [vmem:[#allocation5 + $0x18] sm:$0xff]  ;;  %2332 = vmatpush3.bf16.msra.mxu0 %v2374_v9 }
 0x4f0   : > { %v1584_v12 = vld [vmem:[#allocation5 + $0x10] sm:$0xff]  ;;  %2333 = vmatprep.subr.bf16.mxu0 %v2375_v56 }
 0x4f1   : > { %2313 = vmatprep.mubr.msk.bf16.mxu0 %vm453_vm0, %v1584_v12  ;;  %v2380_v12 = vld [vmem:[%s3312_s7 + $0x38] sm:$0xff]  }
 0x4f2   : > { %2314 = vmatmul.mubr.msk.bf16.gmra.mrb[36].mxu0 %vm453_vm0, %v1585_v28  ;;  %v2125_v28 = vld [vmem:[%s3311_s6] ss:$0 sm:$0xff] }
 0x4f3   : > { %2334 = vmatpush3.bf16.msra.mxu0 %v2375_v56 }
 0x4f4   : > { %2335 = vmatprep.subr.bf16.mxu0 %v2376_v0 }
 0x4f7   : > { %2336 = vmatpush3.bf16.msra.mxu0 %v2376_v0 }
 0x4f8   : > { %2337 = vmatprep.subr.bf16.mxu0 %v2377_v13 }
 0x4fb   : > { %2338 = vmatpush3.bf16.msra.mxu0 %v2377_v13 }
 0x4fc   : > { %2339 = vmatprep.subr.bf16.mxu0 %v2378_v7 }
 0x4ff   : > { %2340 = vmatpush3.bf16.msra.mxu0 %v2378_v7 }
 0x500   : > { %2341 = vmatprep.subr.bf16.mxu0 %v2379_v23 }
 0x503   : > { %2342 = vmatpush3.bf16.msra.mxu0 %v2379_v23 }
 0x504   : > { %2343 = vmatprep.subr.bf16.mxu0 %v2380_v12 }
 0x507   : > { %2344 = vmatpush3.bf16.msra.mxu0 %v2380_v12 }
 0x5bd   : > { %v2311_v35 = vpop.f32.mrb[32].mxu0 }
 0x5be   : > { %v1664_v61 = vadd.f32 %v2311_v35, %v2116_v49  ;;  %v1655_v17 = vpop.f32.mrb[33].mxu0 }
 0x5bf   : > { %v1656_v53 = vadd.f32 %v2116_v49, %v1655_v17  ;;  %v2312_v29 = vpop.f32.mrb[34].mxu0 }
 0x5c0   : > { %v1688_v55 = vadd.f32 %v2513_v26, %v1664_v61  ;;  %v1667_v20 = vadd.f32 %v2312_v29, %v2116_v49  ;;  %v1658_v34 = vpop.f32.mrb[35].mxu0 }
 0x5c1   : > { %v1686_v39 = vadd.f32 %v2514_v15, %v1656_v53  ;;  %v1659_v37 = vadd.f32 %v2116_v49, %v1658_v34 }
 0x5c2   : > { %v1689_v6 = vadd.f32 %v2515_v43, %v1667_v20  ;;  %v1703_v59 = vmul.f32 %v3185_v52, %v1688_v55 }
 0x5c3   : > { %v1701_v2 = vmul.f32 %v3185_v52, %v1686_v39  ;;  %v1687_v47 = vadd.f32 %v2516_v14, %v1659_v37 }
 0x5c4   : > { %v1704_v27 = vmul.f32 %v3185_v52, %v1689_v6  ;;  %v3209_v22 = vadd.f32 %v3195_v50, %v1703_v59 }
 0x5c5   : > { %v1702_v51 = vmul.f32 %v3185_v52, %v1687_v47  ;;  %v2315_v54 = vpop.f32.mrb[36].mxu0  ;;  %v3203_v38 = vadd.f32 %v3195_v50, %v1701_v2 }
 0x5c6   : > { %v3200_v16 = vadd.f32 %v3195_v50, %v1704_v27  ;;  %v1680_v62 = vadd.f32 %v2315_v54, %v2116_v49  ;;  %v1671_v63 = vpop.f32.mrb[37].mxu0 }
 0x5c7   : > { %v3206_v21 = vadd.f32 %v3195_v50, %v1702_v51  ;;  %v1672_v5 = vadd.f32 %v2116_v49, %v1671_v63  ;;  %v2316_v18 = vpop.f32.mrb[38].mxu0 }
 0x5c8   : > { %v1692_v1 = vadd.f32 %v2517_v60, %v1680_v62  ;;  %v1683_v57 = vadd.f32 %v2316_v18, %v2116_v49  ;;  %v1674_v41 = vpop.f32.mrb[39].mxu0  ;;  %v1725_v48 = vpack.c.bf16 %v3200_v16, %v3209_v22  ;;  %v2132_v62 = vld [vmem:[%s3313_s8] ss:$0 sm:$0xff] }
 0x5c9   : > { %v1690_v30 = vadd.f32 %v2518_v10, %v1672_v5  ;;  %v1675_v25 = vadd.f32 %v2116_v49, %v1674_v41  ;;  %v1724_v11 = vpack.c.bf16 %v3206_v21, %v3203_v38 }
 0x5ca   : > { %v1693_v46 = vadd.f32 %v2519_v32, %v1683_v57  ;;  %v1707_v24 = vmul.f32 %v3185_v52, %v1692_v1 }
 0x5cb   : > { %v1705_v36 = vmul.f32 %v3185_v52, %v1690_v30  ;;  %v1691_v4 = vadd.f32 %v2520_v45, %v1675_v25  ;;  %2321 = vmatprep.mubr.msk.bf16.mxu1 %vm453_vm0, %v1724_v11 }
 0x5cc   : > { %v1708_v3 = vmul.f32 %v3185_v52, %v1693_v46  ;;  %2322 = vmatmul.mubr.msk.bf16.vlgmr.msra.gmra.mrb[40].mxu1 %vm453_vm0, %v1725_v48  ;;  %v3235_v58 = vadd.f32 %v3195_v50, %v1707_v24 }
 0x5cd   : > { %v1706_v40 = vmul.f32 %v3185_v52, %v1691_v4  ;;  %v3229_v19 = vadd.f32 %v3195_v50, %v1705_v36 }
 0x5ce   : > { %v3226_v8 = vadd.f32 %v3195_v50, %v1708_v3 }
 0x5cf   : > { %v3232_v31 = vadd.f32 %v3195_v50, %v1706_v40 }
 0x5d0   : > { %v1727_v42 = vpack.c.bf16 %v3226_v8, %v3235_v58 }
 0x5d1   : > { %v1726_v33 = vpack.c.bf16 %v3232_v31, %v3229_v19 }
 0x5d3   : > { %2325 = vmatprep.mubr.msk.bf16.mxu1 %vm453_vm0, %v1726_v33 }
 0x5d4   : > { %2326 = vmatmul.mubr.msk.bf16.gmra.mrb[44].mxu1 %vm453_vm0, %v1727_v42 }
 0x69f   : > { %v2323_v44 = vpop.f32.mrb[40].mxu1 }
 0x6a0   : > { %v1806_v9 = vadd.f32 %v2323_v44, %v2125_v28  ;;  %v1797_v56 = vpop.f32.mrb[41].mxu1 }
 0x6a1   : > { %v1798_v0 = vadd.f32 %v2125_v28, %v1797_v56  ;;  %v2324_v13 = vpop.f32.mrb[42].mxu1 }
 0x6a2   : > { %v1809_v7 = vadd.f32 %v2324_v13, %v2125_v28  ;;  %v1800_v49 = vpop.f32.mrb[43].mxu1  ;;  %v1830_v61 = vmax.f32 %v1806_v9, 0.0 }
 0x6a3   : > { %v1801_v35 = vadd.f32 %v2125_v28, %v1800_v49  ;;  %v1828_v53 = vmax.f32 %v1798_v0, 0.0 }
 0x6a4   : > { %v1831_v17 = vmax.f32 %v1809_v7, 0.0 }
 0x6a5   : > { %v1829_v29 = vmax.f32 %v1801_v35, 0.0 }
 0x6a6   : > { %v1837_v26 = vpack.c.bf16 %v1831_v17, %v1830_v61 }
 0x6a7   : > { %v1836_v55 = vpack.c.bf16 %v1829_v29, %v1828_v53  ;;  %v2327_v20 = vpop.f32.mrb[44].mxu1 }
 0x6a8   : > { %v1822_v34 = vadd.f32 %v2327_v20, %v2125_v28  ;;  %v1813_v15 = vpop.f32.mrb[45].mxu1 }
 0x6a9   : > { %v1814_v39 = vadd.f32 %v2125_v28, %v1813_v15  ;;  %v2328_v37 = vpop.f32.mrb[46].mxu1  ;;  %2345 = vmatprep.mubr.bf16.mxu0 %v1836_v55 }
 0x6aa   : > { %v1825_v43 = vadd.f32 %v2328_v37, %v2125_v28  ;;  %v1816_v6 = vpop.f32.mrb[47].mxu1  ;;  %2346 = vmatmul.mubr.bf16.vlgmr.msra.gmra.mrb[40].mxu0 %v1837_v26  ;;  %v1834_v14 = vmax.f32 %v1822_v34, 0.0 }
 0x6ab   : > { %v1817_v2 = vadd.f32 %v2125_v28, %v1816_v6  ;;  %v1832_v59 = vmax.f32 %v1814_v39, 0.0 }
 0x6ac   : > { %v1835_v47 = vmax.f32 %v1825_v43, 0.0 }
 0x6ad   : > { %v1833_v27 = vmax.f32 %v1817_v2, 0.0 }
 0x6ae   : > { %v1839_v51 = vpack.c.bf16 %v1835_v47, %v1834_v14 }
 0x6af   : > { %v1838_v54 = vpack.c.bf16 %v1833_v27, %v1832_v59 }
 0x6b1   : > { %2349 = vmatprep.mubr.bf16.mxu0 %v1838_v54 }
 0x6b2   : > { %2350 = vmatmul.mubr.bf16.gmra.mrb[44].mxu0 %v1839_v51 }
 0x77d   : > { %v2347_v63 = vpop.f32.mrb[40].mxu0 }
 0x77e   : > { %v1954_v5 = vadd.f32 %v2347_v63, %v2132_v62  ;;  %v1945_v18 = vpop.f32.mrb[41].mxu0 }
 0x77f   : > { %v1946_v60 = vadd.f32 %v2132_v62, %v1945_v18  ;;  %v2348_v1 = vpop.f32.mrb[42].mxu0 }
 0x780   : > { %v1978_v57 = vadd.f32 %v1954_v5, %v3209_v22  ;;  %v1957_v41 = vadd.f32 %v2348_v1, %v2132_v62  ;;  %v1948_v10 = vpop.f32.mrb[43].mxu0 }
 0x781   : > { %v1976_v30 = vadd.f32 %v1946_v60, %v3203_v38  ;;  %v1949_v25 = vadd.f32 %v2132_v62, %v1948_v10 }
 0x782   : > { %v1986_v11 = vmul.f32 %v3185_v52, %v1978_v57  ;;  %v1979_v48 = vadd.f32 %v1957_v41, %v3200_v16 }
 0x783   : > { %v1984_v22 = vmul.f32 %v3185_v52, %v1976_v30  ;;  %v1977_v32 = vadd.f32 %v1949_v25, %v3206_v21 }
 0x784   : > { %v1994_v38 = vadd.f32 %v3195_v50, %v1986_v11  ;;  %v1987_v46 = vmul.f32 %v3185_v52, %v1979_v48 }
 0x785   : > { %v1992_v16 = vadd.f32 %v3195_v50, %v1984_v22  ;;  %v1985_v36 = vmul.f32 %v3185_v52, %v1977_v32  ;;  %v2351_v45 = vpop.f32.mrb[44].mxu0 }
 0x786   : > { %2002 = vst.msk [vmem:[%s3264_s30 + $0x10] sm:$0xff] %vm453_vm0, %v1994_v38  ;;  %v1995_v4 = vadd.f32 %v3195_v50, %v1987_v46  ;;  %v1970_v24 = vadd.f32 %v2351_v45, %v2132_v62  ;;  %v1961_v3 = vpop.f32.mrb[45].mxu0 }
 0x787   : > { %2000 = vst.msk [vmem:[%s3264_s30] sm:$0xff] %vm453_vm0, %v1992_v16  ;;  %v1993_v21 = vadd.f32 %v3195_v50, %v1985_v36  ;;  %v1962_v40 = vadd.f32 %v2132_v62, %v1961_v3  ;;  %v2352_v33 = vpop.f32.mrb[46].mxu0 }
 0x788   : > { %2003 = vst.msk [vmem:[%s3264_s30 + $0x18] sm:$0xff] %vm453_vm0, %v1995_v4  ;;  %v1982_v42 = vadd.f32 %v1970_v24, %v3235_v58  ;;  %v1973_v23 = vadd.f32 %v2352_v33, %v2132_v62  ;;  %v1964_v12 = vpop.f32.mrb[47].mxu0 }
 0x789   : > { %2001 = vst.msk [vmem:[%s3264_s30 + $0x8] sm:$0xff] %vm453_vm0, %v1993_v21  ;;  %v1980_v28 = vadd.f32 %v1962_v40, %v3229_v19  ;;  %v1965_v44 = vadd.f32 %v2132_v62, %v1964_v12 }
 0x78a   : > { %v1990_v9 = vmul.f32 %v3185_v52, %v1982_v42  ;;  %v1983_v56 = vadd.f32 %v1973_v23, %v3226_v8 }
 0x78b   : > { %v1988_v0 = vmul.f32 %v3185_v52, %v1980_v28  ;;  %v1981_v13 = vadd.f32 %v1965_v44, %v3232_v31 }
 0x78c   : > { %v1998_v58 = vadd.f32 %v3195_v50, %v1990_v9  ;;  %v1991_v7 = vmul.f32 %v3185_v52, %v1983_v56 }
 0x78d   : > { %v1996_v49 = vadd.f32 %v3195_v50, %v1988_v0  ;;  %v1989_v35 = vmul.f32 %v3185_v52, %v1981_v13 }
 0x78e   : > { %2006 = vst.msk [vmem:[%s3264_s30 + $0x30] sm:$0xff] %vm453_vm0, %v1998_v58  ;;  %v1999_v19 = vadd.f32 %v3195_v50, %v1991_v7 }
 0x78f   : > { %2004 = vst.msk [vmem:[%s3264_s30 + $0x20] sm:$0xff] %vm453_vm0, %v1996_v49  ;;  %v1997_v8 = vadd.f32 %v3195_v50, %v1989_v35 }
 0x790   : > { %2007 = vst.msk [vmem:[%s3264_s30 + $0x38] sm:$0xff] %vm453_vm0, %v1999_v19 }
 0x791   : > { %2005 = vst.msk [vmem:[%s3264_s30 + $0x28] sm:$0xff] %vm453_vm0, %v1997_v8 }
 0x792 PF: > { %s22_s21 = sadd.s32 1, %s2527_s21  }
 0x793   : > { %p19_p4 = scmp.ge.s32.totalorder %s22_s21, 4  }
 0x795   :  { %21 = sbr.rel (!%p19_p4) target bundleno = 1 (0x1), region = 98 }

</bundles_post_ra>
